<compile_context>
chip_gen: v7x
topology: tpu7x:2x2x1
jax: 0.10.0
libtpu: 0.0.40
codegen_flags: <defaults>
</compile_context>

<pallas_src>
import functools
import math

import jax
import jax.numpy as jnp
from jax.experimental import pallas as pl
from jax.experimental.pallas import tpu as pltpu


def _pick_row_tile(H, W, target_m=256):
    """Largest divisor TH of H with TH*(W+2) <= target_m (fallback 1)."""
    best = 1
    for d in range(1, H + 1):
        if H % d == 0 and d * (W + 2) <= max(target_m, W + 2):
            best = d
    return best


def _pick_n_tile(C_out_p, target=256):
    """Output-channel tile: <= target, multiple of 128 when padded, divides C_out_p."""
    if C_out_p <= target:
        return C_out_p
    best = 128
    for t in range(128, target + 1, 128):
        if C_out_p % t == 0:
            best = t
    return best


def _style_block_kernel(*refs, MB2, W, TN, has_noise, compute_dtype):
    """One grid step == one (batch b, C_out tile n, TH-row tile t)."""
    if has_noise:
        (s_ref, sig_ref, wtaps_ref, bias_ref, x_ref, noise_ref,
         o_ref, w_scr) = refs
    else:
        s_ref, sig_ref, wtaps_ref, bias_ref, x_ref, o_ref, w_scr = refs

    # --- fold modulation + demodulation into the 9 taps ONCE per (b, n) ---
    #   wtaps: (9, C_in, TN)   s: (C_in, 1)   sigma_inv: (1, TN)
    @pl.when(pl.program_id(2) == 0)
    def _():
        w_scr[...] = (wtaps_ref[...] * s_ref[0] * sig_ref[0]).astype(compute_dtype)

    # --- seed the f32 accumulator with bias (+ pre-scaled noise) ---
    if has_noise:
        acc = bias_ref[...] + noise_ref[0, 0]                 # (MB2, TN)
    else:
        acc = jnp.broadcast_to(bias_ref[...], (MB2, TN))

    # --- 3x3 modulated conv on one row block: 9 contiguous-slice MXU matmuls.
    # x is the flattened padded image, so every tap's LHS is a contiguous
    # (MB2, C_in) slice (no slice+reshape relayout copies).  Columns w = W,
    # W+1 of each output row are garbage and get dropped by the wrapper.
    base = pl.program_id(2) * MB2
    if MB2 % 8 == 0:
        base = pl.multiple_of(base, 8)
    for k in range(9):
        dy, dx = divmod(k, 3)
        lhs = x_ref[0, pl.ds(base + dy * (W + 2) + dx, MB2), :]
        acc = acc + jnp.dot(lhs, w_scr[k], preferred_element_type=jnp.float32)

    # --- LeakyReLU(0.2) + store ---
    o_ref[0, 0] = jnp.where(acc >= 0.0, acc, 0.2 * acc).astype(o_ref.dtype)


def style_block_forward(params, x_nchw, w, noise_nchw=None, eps=1e-8,
                        compute_dtype=jnp.bfloat16, out_dtype=None,
                        n_tile_target=256):
    """params hold the raw (un-scaled) parameters, mirroring the PyTorch module.

    n_tile_target: output-channel tile (256 for v6e/v7x MXU, set 128 on v5e).
    out_dtype: kernel output dtype (default: x dtype; pass bf16 to halve
               output HBM traffic when downstream tolerates it).
    """
    B, C_in, H, W = x_nchw.shape
    D = w.shape[1]
    C_out = params["w_conv_hat"].shape[0]
    out_dtype = x_nchw.dtype if out_dtype is None else out_dtype

    # Pad output channels to a lane multiple only when it is (nearly) free.
    C_out_p = ((C_out + 127) // 128) * 128 if C_out >= 128 else C_out
    TN = _pick_n_tile(C_out_p, n_tile_target)
    NT = C_out_p // TN
    pad_c = C_out_p - C_out

    # Equalized-LR scaling constants (parameter-only, done in glue).
    c_style = 1.0 / math.sqrt(D)
    c_conv = 1.0 / math.sqrt(C_in * 9)

    # --- style linear + demodulation factors, batched in XLA (tiny) ---
    s = w.astype(jnp.float32) @ (params["w_style_hat"] * c_style).T \
        + params["b_style"]                                          # (B, C_in)
    w_conv = params["w_conv_hat"] * c_conv                           # (C_out, C_in, 3, 3)
    w_sq = jnp.sum(w_conv ** 2, axis=(2, 3)).T                       # (C_in, C_out)
    sigma_inv = jax.lax.rsqrt((s * s) @ w_sq + eps)                  # (B, C_out)

    # Conv taps in (tap, C_in, C_out_p) form.
    wtaps = jnp.transpose(w_conv, (2, 3, 1, 0)).reshape(9, C_in, C_out)
    wtaps = jnp.pad(wtaps, ((0, 0), (0, 0), (0, pad_c)))
    bias = jnp.pad(params["bias"].reshape(1, C_out), ((0, 0), (0, pad_c)))
    sig = jnp.pad(sigma_inv, ((0, 0), (0, pad_c))).reshape(B, 1, C_out_p)
    s_col = s.reshape(B, C_in, 1)

    TH = _pick_row_tile(H, W)
    HT = H // TH
    MB2 = TH * (W + 2)          # rows per grid step (incl. 2 garbage cols/row)

    # Flattened, spatially zero-padded NHWC input.  2 extra pad rows keep the
    # (dy=2, dx=2) tap of the last tile in bounds; round up to a sublane multiple.
    # TODO(synk): keep activations NHWC across the model so this transpose/pad/
    # cast does not cost separate full-HBM XLA passes; halo-DMA per row tile
    # (pl.ANY + make_async_copy) for very large C_in*H*W on v7x.
    P_raw = (H + 2) * (W + 2)
    P = ((P_raw + 2 + 7) // 8) * 8
    x_nhwc = jnp.transpose(x_nchw, (0, 2, 3, 1))
    x_pad = jnp.pad(x_nhwc, ((0, 0), (1, 1), (1, 1), (0, 0)))
    x_flat = x_pad.reshape(B, P_raw, C_in)
    x_flat = jnp.pad(x_flat, ((0, 0), (0, P - P_raw), (0, 0))).astype(compute_dtype)

    has_noise = noise_nchw is not None

    in_specs = [
        pl.BlockSpec((1, C_in, 1), lambda b, n, t: (b, 0, 0)),        # style s
        pl.BlockSpec((1, 1, TN), lambda b, n, t: (b, 0, n)),          # sigma_inv
        pl.BlockSpec((9, C_in, TN), lambda b, n, t: (0, 0, n)),       # conv taps
        pl.BlockSpec((1, TN), lambda b, n, t: (0, n)),                # out bias
        pl.BlockSpec((1, P, C_in), lambda b, n, t: (b, 0, 0)),        # x (flat, padded)
    ]
    args = [s_col, sig, wtaps, bias, x_flat]
    if has_noise:
        # scale_noise is pre-folded into the noise (no per-step scalar mul,
        # no extra kernel input); rows use the same W+2 indexing as acc.
        noise_s = params["scale_noise"].reshape(1, 1, 1).astype(jnp.float32) \
            * noise_nchw.reshape(B, H, W).astype(jnp.float32)
        noise_s = jnp.pad(noise_s, ((0, 0), (0, 0), (0, 2)))
        noise_s = noise_s.reshape(B, HT, MB2, 1)
        in_specs.append(pl.BlockSpec((1, 1, MB2, 1), lambda b, n, t: (b, t, 0, 0)))
        args.append(noise_s)

    kernel = functools.partial(
        _style_block_kernel, MB2=MB2, W=W, TN=TN,
        has_noise=has_noise, compute_dtype=compute_dtype)

    # Explicit VMEM budget (v7x: 64 MiB physical, 32 MiB scoped default).
    itemsize = jnp.dtype(compute_dtype).itemsize
    vmem_need = (2 * P * C_in * itemsize            # x (double-buffered)
                 + 2 * 9 * C_in * TN * 4            # wtaps (double-buffered)
                 + 9 * C_in * TN * itemsize         # w_mod scratch
                 + 4 * MB2 * TN * 4                 # out block + accumulator
                 + 2 * MB2 * 4                      # noise
                 + (2 << 20))
    vmem_limit = int(min(max(2 * vmem_need, 32 << 20), 64 << 20))

    out_raw = pl.pallas_call(
        kernel,
        out_shape=jax.ShapeDtypeStruct((B, HT, MB2, C_out_p), out_dtype),
        grid=(B, NT, HT),
        in_specs=in_specs,
        out_specs=pl.BlockSpec((1, 1, MB2, TN), lambda b, n, t: (b, t, 0, n)),
        scratch_shapes=[pltpu.VMEM((9, C_in, TN), compute_dtype)],
        compiler_params=pltpu.CompilerParams(
            dimension_semantics=("parallel", "parallel", "arbitrary"),
            vmem_limit_bytes=vmem_limit),
    )(*args)

    # Drop the 2 garbage columns per row + any channel padding, back to NCHW
    # (fuses with the transpose that is needed anyway for NCHW output).
    out = out_raw.reshape(B, HT, TH, W + 2, C_out_p)[:, :, :, :W, :C_out]
    out = out.reshape(B, H, W, C_out)
    return jnp.transpose(out, (0, 3, 1, 2))


def style_block_reference(params, x, w, noise, eps=1e-8):
    """Pure-JAX reference mirroring the PyTorch module exactly (NCHW)."""
    B, C_in, H, W = x.shape
    D = w.shape[1]
    C_out = params["w_conv_hat"].shape[0]
    c_style = 1.0 / math.sqrt(D)
    c_conv = 1.0 / math.sqrt(C_in * 9)

    s = w @ (params["w_style_hat"] * c_style).T + params["b_style"]      # (B, C_in)
    weights = (params["w_conv_hat"] * c_conv)[None] * s[:, None, :, None, None]
    sigma_inv = jax.lax.rsqrt(
        jnp.sum(weights ** 2, axis=(2, 3, 4), keepdims=True) + eps)
    weights = weights * sigma_inv
    x_g = x.reshape(1, B * C_in, H, W)
    w_g = weights.reshape(B * C_out, C_in, 3, 3)
    y = jax.lax.conv_general_dilated(
        x_g, w_g, window_strides=(1, 1), padding=((1, 1), (1, 1)),
        dimension_numbers=("NCHW", "OIHW", "NCHW"), feature_group_count=B)
    y = y.reshape(B, C_out, H, W)
    if noise is not None:
        y = y + params["scale_noise"].reshape(1, 1, 1, 1) * noise
    y = y + params["bias"].reshape(1, C_out, 1, 1)
    return jnp.where(y >= 0, y, 0.2 * y)


if __name__ == "__main__":
    def make_params(key, D, C_in, C_out):
        k1, k2, k3 = jax.random.split(key, 3)
        # PyTorch inits scale_noise=0 and bias=0; use small nonzero values so
        # the noise / bias paths are actually exercised and checked.
        return {
            "w_style_hat": jax.random.normal(k1, (C_in, D), jnp.float32),
            "b_style": jnp.ones((C_in,), jnp.float32),          # bias=1.0
            "w_conv_hat": jax.random.normal(k2, (C_out, C_in, 3, 3), jnp.float32),
            "scale_noise": jnp.full((1,), 0.1, jnp.float32),
            "bias": 0.1 * jax.random.normal(k3, (C_out,), jnp.float32),
        }

    root = jax.random.PRNGKey(0)
    key_a, key_b, key_c = jax.random.split(root, 3)

    # --- Config A: canonical small shape (B=2, C_in=4, C_out=8, 16x16, D=32) ---
    B, C_in, C_out, H, W, D = 2, 4, 8, 16, 16, 32
    kp, kx, kw, kn = jax.random.split(key_a, 4)
    params = make_params(kp, D, C_in, C_out)
    x = jax.random.normal(kx, (B, C_in, H, W), jnp.float32)
    w_lat = jax.random.normal(kw, (B, D), jnp.float32)
    noise = jax.random.normal(kn, (B, 1, H, W), jnp.float32)

    ref = style_block_reference(params, x, w_lat, noise)

    # f32 MXU-input path: tight check against the reference.
    out_f32 = jax.block_until_ready(
        style_block_forward(params, x, w_lat, noise, compute_dtype=jnp.float32))
    assert out_f32.shape == (B, C_out, H, W)
    assert bool(jnp.allclose(out_f32, ref, atol=1e-4, rtol=1e-4)), "f32 mismatch"

    # bf16 MXU-input path (default): loose check (bf16 inputs, f32 accumulate).
    out_bf16 = jax.block_until_ready(style_block_forward(params, x, w_lat, noise))
    assert bool(jnp.allclose(out_bf16, ref, atol=5e-2, rtol=5e-2)), "bf16 mismatch"

    # noise=None specialization (no noise input / DMA / add compiled at all).
    ref_nn = style_block_reference(params, x, w_lat, None)
    out_nn = jax.block_until_ready(
        style_block_forward(params, x, w_lat, None, compute_dtype=jnp.float32))
    assert bool(jnp.allclose(out_nn, ref_nn, atol=1e-4, rtol=1e-4)), "no-noise mismatch"

    # --- Config B: exercises the multi-row-tile grid path (H//TH > 1) ---
    B2, C_in2, C_out2, H2, W2, D2 = 2, 8, 16, 32, 32, 32
    kp2, kx2, kw2, kn2 = jax.random.split(key_b, 4)
    params2 = make_params(kp2, D2, C_in2, C_out2)
    x2 = jax.random.normal(kx2, (B2, C_in2, H2, W2), jnp.float32)
    w2_lat = jax.random.normal(kw2, (B2, D2), jnp.float32)
    noise2 = jax.random.normal(kn2, (B2, 1, H2, W2), jnp.float32)
    ref2 = style_block_reference(params2, x2, w2_lat, noise2)
    out2 = jax.block_until_ready(
        style_block_forward(params2, x2, w2_lat, noise2, compute_dtype=jnp.float32))
    assert bool(jnp.allclose(out2, ref2, atol=1e-4, rtol=1e-4)), "tiled-H mismatch"

    # --- Config C: exercises the output-channel tiling path (NT > 1) ---
    B3, C_in3, C_out3, H3, W3, D3 = 1, 16, 256, 16, 16, 32
    kp3, kx3, kw3, kn3 = jax.random.split(key_c, 4)
    params3 = make_params(kp3, D3, C_in3, C_out3)
    x3 = jax.random.normal(kx3, (B3, C_in3, H3, W3), jnp.float32)
    w3_lat = jax.random.normal(kw3, (B3, D3), jnp.float32)
    noise3 = jax.random.normal(kn3, (B3, 1, H3, W3), jnp.float32)
    ref3 = style_block_reference(params3, x3, w3_lat, noise3)
    out3 = jax.block_until_ready(
        style_block_forward(params3, x3, w3_lat, noise3,
                            compute_dtype=jnp.float32, n_tile_target=128))
    assert bool(jnp.allclose(out3, ref3, atol=1e-4, rtol=1e-4)), "N-tiled mismatch"

    print("KERNEL_OK")
</pallas_src>

<mosaic_0001>
module attributes {stable_mosaic.version = 11 : i64} {
  func.func @_style_block_kernel(%arg0: i32, %arg1: i32, %arg2: i32, %arg3: memref<1x4x1xf32, #tpu.memory_space<vmem>>, %arg4: memref<1x1x8xf32, #tpu.memory_space<vmem>>, %arg5: memref<9x4x8xf32, #tpu.memory_space<vmem>>, %arg6: memref<1x8xf32, #tpu.memory_space<vmem>>, %arg7: memref<1x328x4xf32, #tpu.memory_space<vmem>>, %arg8: memref<1x1x144x1xf32, #tpu.memory_space<vmem>>, %arg9: memref<1x1x144x8xf32, #tpu.memory_space<vmem>>, %arg10: memref<9x4x8xf32, #tpu.memory_space<vmem>>) attributes {dimension_semantics = [#tpu.dimension_semantics<parallel>, #tpu.dimension_semantics<parallel>, #tpu.dimension_semantics<arbitrary>], iteration_bounds = array<i64: 2, 1, 2>, scalar_prefetch = 0 : i64, scratch_operands = 1 : i64, tpu.core_type = #tpu.core_type<tc>, window_params = [{transform_indices = @transform_0, window_bounds = array<i64: 1, 4, 1>}, {transform_indices = @transform_1, window_bounds = array<i64: 1, 1, 8>}, {transform_indices = @transform_2, window_bounds = array<i64: 9, 4, 8>}, {transform_indices = @transform_3, window_bounds = array<i64: 1, 8>}, {transform_indices = @transform_4, window_bounds = array<i64: 1, 328, 4>}, {transform_indices = @transform_5, window_bounds = array<i64: 1, 1, 144, 1>}, {transform_indices = @transform_6, window_bounds = array<i64: 1, 1, 144, 8>}]} {
    %c0_i32 = arith.constant 0 : i32
    %0 = arith.cmpi eq, %arg2, %c0_i32 : i32
    %1 = arith.extui %0 : i1 to i32
    %c0_i32_0 = arith.constant 0 : i32
    %2 = arith.cmpi ne, %1, %c0_i32_0 : i32
    scf.if %2 {
      %c0_71 = arith.constant 0 : index
      %c0_72 = arith.constant 0 : index
      %c0_73 = arith.constant 0 : index
      %100 = vector.load %arg5[%c0_71, %c0_72, %c0_73] : memref<9x4x8xf32, #tpu.memory_space<vmem>>, vector<9x4x8xf32>
      %c0_74 = arith.constant 0 : index
      %c0_75 = arith.constant 0 : index
      %c0_76 = arith.constant 0 : index
      %101 = vector.load %arg3[%c0_74, %c0_75, %c0_76] : memref<1x4x1xf32, #tpu.memory_space<vmem>>, vector<1x4x1xf32>
      %102 = vector.shape_cast %101 : vector<1x4x1xf32> to vector<4x1xf32>
      %103 = vector.shape_cast %102 : vector<4x1xf32> to vector<1x4x1xf32>
      %104 = vector.broadcast %103 : vector<1x4x1xf32> to vector<9x4x8xf32>
      %105 = arith.mulf %100, %104 : vector<9x4x8xf32>
      %c0_77 = arith.constant 0 : index
      %c0_78 = arith.constant 0 : index
      %c0_79 = arith.constant 0 : index
      %106 = vector.load %arg4[%c0_77, %c0_78, %c0_79] : memref<1x1x8xf32, #tpu.memory_space<vmem>>, vector<1x1x8xf32>
      %107 = vector.shape_cast %106 : vector<1x1x8xf32> to vector<1x8xf32>
      %108 = vector.shape_cast %107 : vector<1x8xf32> to vector<1x1x8xf32>
      %109 = vector.broadcast %108 : vector<1x1x8xf32> to vector<9x4x8xf32>
      %110 = arith.mulf %105, %109 : vector<9x4x8xf32>
      %c0_80 = arith.constant 0 : index
      %c0_81 = arith.constant 0 : index
      %c0_82 = arith.constant 0 : index
      %111 = vector.load %arg10[%c0_80, %c0_81, %c0_82] : memref<9x4x8xf32, #tpu.memory_space<vmem>>, vector<9x4x8xf32>
      tpu.vector_store %arg10[%c0_80, %c0_81, %c0_82], %110 {strides = array<i32>} : memref<9x4x8xf32, #tpu.memory_space<vmem>>, vector<9x4x8xf32>,
    } else {
    }
    %c0 = arith.constant 0 : index
    %c0_1 = arith.constant 0 : index
    %3 = vector.load %arg6[%c0, %c0_1] : memref<1x8xf32, #tpu.memory_space<vmem>>, vector<1x8xf32>
    %c0_2 = arith.constant 0 : index
    %c0_3 = arith.constant 0 : index
    %c0_4 = arith.constant 0 : index
    %c0_5 = arith.constant 0 : index
    %4 = vector.load %arg8[%c0_2, %c0_3, %c0_4, %c0_5] : memref<1x1x144x1xf32, #tpu.memory_space<vmem>>, vector<1x1x144x1xf32>
    %5 = vector.shape_cast %4 : vector<1x1x144x1xf32> to vector<144x1xf32>
    %6 = vector.broadcast %3 : vector<1x8xf32> to vector<144x8xf32>
    %7 = vector.broadcast %5 : vector<144x1xf32> to vector<144x8xf32>
    %8 = arith.addf %6, %7 : vector<144x8xf32>
    %c144_i32 = arith.constant 144 : i32
    %9 = arith.muli %arg2, %c144_i32 : i32
    %10 = tpu.assume_multiple %9, 8 : i32
    %c0_i32_6 = arith.constant 0 : i32
    %11 = arith.addi %10, %c0_i32_6 : i32
    %c0_i32_7 = arith.constant 0 : i32
    %12 = arith.addi %11, %c0_i32_7 : i32
    %c0_8 = arith.constant 0 : index
    %13 = arith.index_cast %12 : i32 to index
    %c0_9 = arith.constant 0 : index
    %14 = vector.load %arg7[%c0_8, %13, %c0_9] : memref<1x328x4xf32, #tpu.memory_space<vmem>>, vector<1x144x4xf32>
    %15 = vector.shape_cast %14 : vector<1x144x4xf32> to vector<144x4xf32>
    %c0_10 = arith.constant 0 : index
    %c0_11 = arith.constant 0 : index
    %c0_12 = arith.constant 0 : index
    %16 = vector.load %arg10[%c0_10, %c0_11, %c0_12] : memref<9x4x8xf32, #tpu.memory_space<vmem>>, vector<1x4x8xf32>
    %17 = vector.shape_cast %16 : vector<1x4x8xf32> to vector<4x8xf32>
    %cst = arith.constant dense<0.000000e+00> : vector<144x8xf32>
    %18 = tpu.matmul %15, %17, %cst {dimension_numbers = #tpu.dot_dimension_numbers<[1], [0], [0], [1], [0, 0, 1, 1], [], []>} : vector<144x4xf32>, vector<4x8xf32>, vector<144x8xf32> -> vector<144x8xf32>
    %19 = arith.addf %8, %18 : vector<144x8xf32>
    %c0_i32_13 = arith.constant 0 : i32
    %20 = arith.addi %10, %c0_i32_13 : i32
    %c1_i32 = arith.constant 1 : i32
    %21 = arith.addi %20, %c1_i32 : i32
    %c0_14 = arith.constant 0 : index
    %22 = arith.index_cast %21 : i32 to index
    %c0_15 = arith.constant 0 : index
    %23 = vector.load %arg7[%c0_14, %22, %c0_15] : memref<1x328x4xf32, #tpu.memory_space<vmem>>, vector<1x144x4xf32>
    %24 = vector.shape_cast %23 : vector<1x144x4xf32> to vector<144x4xf32>
    %c1 = arith.constant 1 : index
    %c0_16 = arith.constant 0 : index
    %c0_17 = arith.constant 0 : index
    %25 = vector.load %arg10[%c1, %c0_16, %c0_17] : memref<9x4x8xf32, #tpu.memory_space<vmem>>, vector<1x4x8xf32>
    %26 = vector.shape_cast %25 : vector<1x4x8xf32> to vector<4x8xf32>
    %cst_18 = arith.constant dense<0.000000e+00> : vector<144x8xf32>
    %27 = tpu.matmul %24, %26, %cst_18 {dimension_numbers = #tpu.dot_dimension_numbers<[1], [0], [0], [1], [0, 0, 1, 1], [], []>} : vector<144x4xf32>, vector<4x8xf32>, vector<144x8xf32> -> vector<144x8xf32>
    %28 = arith.addf %19, %27 : vector<144x8xf32>
    %c0_i32_19 = arith.constant 0 : i32
    %29 = arith.addi %10, %c0_i32_19 : i32
    %c2_i32 = arith.constant 2 : i32
    %30 = arith.addi %29, %c2_i32 : i32
    %c0_20 = arith.constant 0 : index
    %31 = arith.index_cast %30 : i32 to index
    %c0_21 = arith.constant 0 : index
    %32 = vector.load %arg7[%c0_20, %31, %c0_21] : memref<1x328x4xf32, #tpu.memory_space<vmem>>, vector<1x144x4xf32>
    %33 = vector.shape_cast %32 : vector<1x144x4xf32> to vector<144x4xf32>
    %c2 = arith.constant 2 : index
    %c0_22 = arith.constant 0 : index
    %c0_23 = arith.constant 0 : index
    %34 = vector.load %arg10[%c2, %c0_22, %c0_23] : memref<9x4x8xf32, #tpu.memory_space<vmem>>, vector<1x4x8xf32>
    %35 = vector.shape_cast %34 : vector<1x4x8xf32> to vector<4x8xf32>
    %cst_24 = arith.constant dense<0.000000e+00> : vector<144x8xf32>
    %36 = tpu.matmul %33, %35, %cst_24 {dimension_numbers = #tpu.dot_dimension_numbers<[1], [0], [0], [1], [0, 0, 1, 1], [], []>} : vector<144x4xf32>, vector<4x8xf32>, vector<144x8xf32> -> vector<144x8xf32>
    %37 = arith.addf %28, %36 : vector<144x8xf32>
    %c18_i32 = arith.constant 18 : i32
    %38 = arith.addi %10, %c18_i32 : i32
    %c0_i32_25 = arith.constant 0 : i32
    %39 = arith.addi %38, %c0_i32_25 : i32
    %c0_26 = arith.constant 0 : index
    %40 = arith.index_cast %39 : i32 to index
    %c0_27 = arith.constant 0 : index
    %41 = vector.load %arg7[%c0_26, %40, %c0_27] : memref<1x328x4xf32, #tpu.memory_space<vmem>>, vector<1x144x4xf32>
    %42 = vector.shape_cast %41 : vector<1x144x4xf32> to vector<144x4xf32>
    %c3 = arith.constant 3 : index
    %c0_28 = arith.constant 0 : index
    %c0_29 = arith.constant 0 : index
    %43 = vector.load %arg10[%c3, %c0_28, %c0_29] : memref<9x4x8xf32, #tpu.memory_space<vmem>>, vector<1x4x8xf32>
    %44 = vector.shape_cast %43 : vector<1x4x8xf32> to vector<4x8xf32>
    %cst_30 = arith.constant dense<0.000000e+00> : vector<144x8xf32>
    %45 = tpu.matmul %42, %44, %cst_30 {dimension_numbers = #tpu.dot_dimension_numbers<[1], [0], [0], [1], [0, 0, 1, 1], [], []>} : vector<144x4xf32>, vector<4x8xf32>, vector<144x8xf32> -> vector<144x8xf32>
    %46 = arith.addf %37, %45 : vector<144x8xf32>
    %c18_i32_31 = arith.constant 18 : i32
    %47 = arith.addi %10, %c18_i32_31 : i32
    %c1_i32_32 = arith.constant 1 : i32
    %48 = arith.addi %47, %c1_i32_32 : i32
    %c0_33 = arith.constant 0 : index
    %49 = arith.index_cast %48 : i32 to index
    %c0_34 = arith.constant 0 : index
    %50 = vector.load %arg7[%c0_33, %49, %c0_34] : memref<1x328x4xf32, #tpu.memory_space<vmem>>, vector<1x144x4xf32>
    %51 = vector.shape_cast %50 : vector<1x144x4xf32> to vector<144x4xf32>
    %c4 = arith.constant 4 : index
    %c0_35 = arith.constant 0 : index
    %c0_36 = arith.constant 0 : index
    %52 = vector.load %arg10[%c4, %c0_35, %c0_36] : memref<9x4x8xf32, #tpu.memory_space<vmem>>, vector<1x4x8xf32>
    %53 = vector.shape_cast %52 : vector<1x4x8xf32> to vector<4x8xf32>
    %cst_37 = arith.constant dense<0.000000e+00> : vector<144x8xf32>
    %54 = tpu.matmul %51, %53, %cst_37 {dimension_numbers = #tpu.dot_dimension_numbers<[1], [0], [0], [1], [0, 0, 1, 1], [], []>} : vector<144x4xf32>, vector<4x8xf32>, vector<144x8xf32> -> vector<144x8xf32>
    %55 = arith.addf %46, %54 : vector<144x8xf32>
    %c18_i32_38 = arith.constant 18 : i32
    %56 = arith.addi %10, %c18_i32_38 : i32
    %c2_i32_39 = arith.constant 2 : i32
    %57 = arith.addi %56, %c2_i32_39 : i32
    %c0_40 = arith.constant 0 : index
    %58 = arith.index_cast %57 : i32 to index
    %c0_41 = arith.constant 0 : index
    %59 = vector.load %arg7[%c0_40, %58, %c0_41] : memref<1x328x4xf32, #tpu.memory_space<vmem>>, vector<1x144x4xf32>
    %60 = vector.shape_cast %59 : vector<1x144x4xf32> to vector<144x4xf32>
    %c5 = arith.constant 5 : index
    %c0_42 = arith.constant 0 : index
    %c0_43 = arith.constant 0 : index
    %61 = vector.load %arg10[%c5, %c0_42, %c0_43] : memref<9x4x8xf32, #tpu.memory_space<vmem>>, vector<1x4x8xf32>
    %62 = vector.shape_cast %61 : vector<1x4x8xf32> to vector<4x8xf32>
    %cst_44 = arith.constant dense<0.000000e+00> : vector<144x8xf32>
    %63 = tpu.matmul %60, %62, %cst_44 {dimension_numbers = #tpu.dot_dimension_numbers<[1], [0], [0], [1], [0, 0, 1, 1], [], []>} : vector<144x4xf32>, vector<4x8xf32>, vector<144x8xf32> -> vector<144x8xf32>
    %64 = arith.addf %55, %63 : vector<144x8xf32>
    %c36_i32 = arith.constant 36 : i32
    %65 = arith.addi %10, %c36_i32 : i32
    %c0_i32_45 = arith.constant 0 : i32
    %66 = arith.addi %65, %c0_i32_45 : i32
    %c0_46 = arith.constant 0 : index
    %67 = arith.index_cast %66 : i32 to index
    %c0_47 = arith.constant 0 : index
    %68 = vector.load %arg7[%c0_46, %67, %c0_47] : memref<1x328x4xf32, #tpu.memory_space<vmem>>, vector<1x144x4xf32>
    %69 = vector.shape_cast %68 : vector<1x144x4xf32> to vector<144x4xf32>
    %c6 = arith.constant 6 : index
    %c0_48 = arith.constant 0 : index
    %c0_49 = arith.constant 0 : index
    %70 = vector.load %arg10[%c6, %c0_48, %c0_49] : memref<9x4x8xf32, #tpu.memory_space<vmem>>, vector<1x4x8xf32>
    %71 = vector.shape_cast %70 : vector<1x4x8xf32> to vector<4x8xf32>
    %cst_50 = arith.constant dense<0.000000e+00> : vector<144x8xf32>
    %72 = tpu.matmul %69, %71, %cst_50 {dimension_numbers = #tpu.dot_dimension_numbers<[1], [0], [0], [1], [0, 0, 1, 1], [], []>} : vector<144x4xf32>, vector<4x8xf32>, vector<144x8xf32> -> vector<144x8xf32>
    %73 = arith.addf %64, %72 : vector<144x8xf32>
    %c36_i32_51 = arith.constant 36 : i32
    %74 = arith.addi %10, %c36_i32_51 : i32
    %c1_i32_52 = arith.constant 1 : i32
    %75 = arith.addi %74, %c1_i32_52 : i32
    %c0_53 = arith.constant 0 : index
    %76 = arith.index_cast %75 : i32 to index
    %c0_54 = arith.constant 0 : index
    %77 = vector.load %arg7[%c0_53, %76, %c0_54] : memref<1x328x4xf32, #tpu.memory_space<vmem>>, vector<1x144x4xf32>
    %78 = vector.shape_cast %77 : vector<1x144x4xf32> to vector<144x4xf32>
    %c7 = arith.constant 7 : index
    %c0_55 = arith.constant 0 : index
    %c0_56 = arith.constant 0 : index
    %79 = vector.load %arg10[%c7, %c0_55, %c0_56] : memref<9x4x8xf32, #tpu.memory_space<vmem>>, vector<1x4x8xf32>
    %80 = vector.shape_cast %79 : vector<1x4x8xf32> to vector<4x8xf32>
    %cst_57 = arith.constant dense<0.000000e+00> : vector<144x8xf32>
    %81 = tpu.matmul %78, %80, %cst_57 {dimension_numbers = #tpu.dot_dimension_numbers<[1], [0], [0], [1], [0, 0, 1, 1], [], []>} : vector<144x4xf32>, vector<4x8xf32>, vector<144x8xf32> -> vector<144x8xf32>
    %82 = arith.addf %73, %81 : vector<144x8xf32>
    %c36_i32_58 = arith.constant 36 : i32
    %83 = arith.addi %10, %c36_i32_58 : i32
    %c2_i32_59 = arith.constant 2 : i32
    %84 = arith.addi %83, %c2_i32_59 : i32
    %c0_60 = arith.constant 0 : index
    %85 = arith.index_cast %84 : i32 to index
    %c0_61 = arith.constant 0 : index
    %86 = vector.load %arg7[%c0_60, %85, %c0_61] : memref<1x328x4xf32, #tpu.memory_space<vmem>>, vector<1x144x4xf32>
    %87 = vector.shape_cast %86 : vector<1x144x4xf32> to vector<144x4xf32>
    %c8 = arith.constant 8 : index
    %c0_62 = arith.constant 0 : index
    %c0_63 = arith.constant 0 : index
    %88 = vector.load %arg10[%c8, %c0_62, %c0_63] : memref<9x4x8xf32, #tpu.memory_space<vmem>>, vector<1x4x8xf32>
    %89 = vector.shape_cast %88 : vector<1x4x8xf32> to vector<4x8xf32>
    %cst_64 = arith.constant dense<0.000000e+00> : vector<144x8xf32>
    %90 = tpu.matmul %87, %89, %cst_64 {dimension_numbers = #tpu.dot_dimension_numbers<[1], [0], [0], [1], [0, 0, 1, 1], [], []>} : vector<144x4xf32>, vector<4x8xf32>, vector<144x8xf32> -> vector<144x8xf32>
    %91 = arith.addf %82, %90 : vector<144x8xf32>
    %cst_65 = arith.constant 0.000000e+00 : f32
    %92 = vector.broadcast %cst_65 : f32 to vector<144x8xf32>
    %93 = arith.cmpf oge, %91, %92 : vector<144x8xf32>
    %cst_66 = arith.constant 2.000000e-01 : f32
    %94 = vector.broadcast %cst_66 : f32 to vector<144x8xf32>
    %95 = arith.mulf %94, %91 : vector<144x8xf32>
    %96 = arith.select %93, %91, %95 : vector<144x8xi1>, vector<144x8xf32>
    %c0_67 = arith.constant 0 : index
    %c0_68 = arith.constant 0 : index
    %c0_69 = arith.constant 0 : index
    %c0_70 = arith.constant 0 : index
    %97 = vector.load %arg9[%c0_67, %c0_68, %c0_69, %c0_70] : memref<1x1x144x8xf32, #tpu.memory_space<vmem>>, vector<1x1x144x8xf32>
    %98 = vector.shape_cast %97 : vector<1x1x144x8xf32> to vector<144x8xf32>
    %99 = vector.shape_cast %96 : vector<144x8xf32> to vector<1x1x144x8xf32>
    tpu.vector_store %arg9[%c0_67, %c0_68, %c0_69, %c0_70], %99 {strides = array<i32>} : memref<1x1x144x8xf32, #tpu.memory_space<vmem>>, vector<1x1x144x8xf32>,
    return
  }
  func.func @transform_0(%arg0: i32, %arg1: i32, %arg2: i32) -> (i32, i32, i32) {
    %c0_i32 = arith.constant 0 : i32
    %c0_i32_0 = arith.constant 0 : i32
    %c0_i32_1 = arith.constant 0 : i32
    return %arg0, %c0_i32, %c0_i32_0 : i32, i32, i32
  }
  func.func @transform_1(%arg0: i32, %arg1: i32, %arg2: i32) -> (i32, i32, i32) {
    %c0_i32 = arith.constant 0 : i32
    %c0_i32_0 = arith.constant 0 : i32
    return %arg0, %c0_i32, %arg1 : i32, i32, i32
  }
  func.func @transform_2(%arg0: i32, %arg1: i32, %arg2: i32) -> (i32, i32, i32) {
    %c0_i32 = arith.constant 0 : i32
    %c0_i32_0 = arith.constant 0 : i32
    %c0_i32_1 = arith.constant 0 : i32
    return %c0_i32, %c0_i32_0, %arg1 : i32, i32, i32
  }
  func.func @transform_3(%arg0: i32, %arg1: i32, %arg2: i32) -> (i32, i32) {
    %c0_i32 = arith.constant 0 : i32
    %c0_i32_0 = arith.constant 0 : i32
    return %c0_i32, %arg1 : i32, i32
  }
  func.func @transform_4(%arg0: i32, %arg1: i32, %arg2: i32) -> (i32, i32, i32) {
    %c0_i32 = arith.constant 0 : i32
    %c0_i32_0 = arith.constant 0 : i32
    %c0_i32_1 = arith.constant 0 : i32
    return %arg0, %c0_i32, %c0_i32_0 : i32, i32, i32
  }
  func.func @transform_5(%arg0: i32, %arg1: i32, %arg2: i32) -> (i32, i32, i32, i32) {
    %c0_i32 = arith.constant 0 : i32
    %c0_i32_0 = arith.constant 0 : i32
    %c0_i32_1 = arith.constant 0 : i32
    return %arg0, %arg2, %c0_i32, %c0_i32_0 : i32, i32, i32, i32
  }
  func.func @transform_6(%arg0: i32, %arg1: i32, %arg2: i32) -> (i32, i32, i32, i32) {
    %c0_i32 = arith.constant 0 : i32
    %c0_i32_0 = arith.constant 0 : i32
    return %arg0, %arg2, %c0_i32, %arg1 : i32, i32, i32, i32
  }
}

</mosaic_0001>

<bundles_post_ra>
// kernel: tpu_custom_call.1
= control target key start
LH: loop header
LB: loop body
LE: loop exit
PB: predicated region body
PF: predicated region fallthrough
CT: control target
= control target key end

     0   :  { %s4175_s21 = smov 0   ;;  %s4177_s22 = smov 0   ;;  %s4787_s0 = inlined_call_operand.vmem [shape: f32[2,4,1], index: 0, kind: input, shape index: {}]   ;;  %s4788_s1 = inlined_call_operand.vmem [shape: f32[2,1,8], index: 1, kind: input, shape index: {}]   ;;  %s4789_s2 = inlined_call_operand.vmem [shape: f32[9,4,8], index: 2, kind: input, shape index: {}]   ;;  %s4790_s3 = inlined_call_operand.vmem [shape: f32[1,8], index: 3, kind: input, shape index: {}]   ;;  %s4791_s4 = inlined_call_operand.vmem [shape: f32[2,328,4], index: 4, kind: input, shape index: {}]   ;;  %s4792_s5 = inlined_call_operand.vmem [shape: f32[2,2,144,1], index: 5, kind: input, shape index: {}]   ;;  %s4793_s6 = inlined_call_operand.vmem [shape: f32[2,2,144,8], index: 6, kind: output, shape index: {}]  }
   0x1   :  { %s4179_s23 = smov 0   ;;  %s4181_s24 = smov 0  }
   0x2   :  { %s4183_s25 = smov 0  }
   0x3 LB: > { %s28_s26 = sadd.s32 1, %s4128_s23  ;;  %s35_s27 = sadd.s32 1, %s4132_s24  ;;  %s4136_s25 = sphi %s4183_s25, %s16_s25   ;;  %s4132_s24 = sphi %s4181_s24, %s4801_s24   ;;  %s4128_s23 = sphi %s4179_s23, %s4800_s23   ;;  %s4124_s22 = sphi %s4177_s22, %s4799_s22   ;;  %s4120_s21 = sphi %s4175_s21, %s4798_s21  }
   0x4   : > { %p29_p0 = scmp.ge.s32.totalorder %s28_s26, 2  ;;  %p3129_p1 = scmp.ge.s32.totalorder %s4136_s25, 1 }
   0x5   : > { %p290_p2 = scmp.lt.s32.totalorder %s4136_s25, 5 }
   0x6   : > { %s4803_s26 = smov (%p29_p0, %s28_s26), 0  ;;  %s4805_s27 = smov (!%p29_p0, %s35_s27), %s4132_s24 }
   0x7   : > { %4794 = sst [smem:[#allocation3_spill]] %s4803_s26  ;;  %p291_p3 = pnand %p3129_p1, %p290_p2 }
   0x8   : > { %p37_p4 = scmp.ge.s32.totalorder %s4805_s27, 2  ;;  %p353_p5 = scmp.lt.s32.totalorder (!%p291_p3), %s4124_s22, 1 }
   0x9   : > { %294 = sbr.rel (%p291_p3) target bundleno = 545 (0x221), region = 44  ;;  %p377_p6 = scmp.lt.s32.totalorder (!%p291_p3), %s4120_s21, 1 }
   0xa   : > { %s4807_s27 = smov (%p37_p4, %s4805_s27), 0  ;;  %p3134_p7 = scmp.ne.s32.totalorder (!%p291_p3), %s4120_s21, 0 }
   0xb   : > { %4795 = sst [smem:[#allocation4_spill]] %s4807_s27 }
  0x10   : > { %s4809_s22 = smov (!%p353_p5, %s4124_s22), 1  ;;  %v4138_v1 = vmov (!%p3134_p7), 0   ;;  %v400_v2 = vld [vmem:[%s4789_s2] sm:$0xf] (!%p3134_p7)  ;;  %v401_v3 = vld [vmem:[%s4789_s2 + $0x4] sm:$0xf] (!%p3134_p7) }
  0x11   : > { %s378_s28 = scalar_select %p377_p6, %s4120_s21, 1 }
  0x12   : > { %s3130_s29 = sshll.u32 %s4809_s22, 2  ;;  %s362_s8 = scalar_lea.vmem %s4788_s1, %s4809_s22  ;;  %4095 = vset.pattern.permute.xlu0 (!%p3134_p7), %v4138_v1  ;;  %v402_v4 = vld [vmem:[%s4789_s2 + $0x8] sm:$0xf] (!%p3134_p7)  ;;  %v403_v5 = vld [vmem:[%s4789_s2 + $0xc] sm:$0xf] (!%p3134_p7)  ;;  %vm440_vm0 = vcmask (!%p3134_p7), 60416  }
  0x13   : > { %s356_s11 = scalar_lea.vmem %s4787_s0, %s3130_s29  ;;  %s4050_s12 = smul.u32 328, %s4809_s22  ;;  %v404_v6 = vld [vmem:[%s4789_s2 + $0x10] sm:$0xf] (!%p3134_p7)  ;;  %v405_v7 = vld [vmem:[%s4789_s2 + $0x14] sm:$0xf] (!%p3134_p7) }
  0x14   : > { %s4051_s13 = smul.u32 18, %s378_s28  ;;  %v409_v0 = vld [vmem:[%s356_s11] sm:$0xf] (!%p3134_p7)  ;;  %v406_v8 = vld [vmem:[%s4789_s2 + $0x18] sm:$0xf] (!%p3134_p7) }
  0x15   : > { %s4218_s16 = scalar_lea.vmem %s4791_s4, %s4050_s12  ;;  %s4052_s17 = smul.u32 36, %s4809_s22  ;;  %412 = vperm.xlu0 (!%p3134_p7), %4095, %v409_v0   ;;  %v407_v9 = vld [vmem:[%s4789_s2 + $0x1c] sm:$0xf] (!%p3134_p7)  ;;  %v3135_v10 = vld [vmem:[%s362_s8] ss:$0 sm:$0xff] (!%p3134_p7) }
  0x16   : > { %399 = sbr.rel (%p3134_p7) target bundleno = 158 (0x9e), region = 48  ;;  %v408_v12 = vld [vmem:[%s4789_s2 + $0x20] sm:$0xf] (!%p3134_p7) }
  0x17   : > { %s381_s18 = sadd.s32 %s4052_s17, %s4051_s13 }
  0x18   : > { %s3132_s19 = sshll.u32 %s381_s18, 3 }
  0x19   : > { %s4223_s26 = scalar_lea.vmem %s4792_s5, %s3132_s19  ;;  %s4228_s9 = scalar_lea.vmem %s4793_s6, %s3132_s19 }
  0x94   : > { %v413_v11 = vpop.permute.xlu0 %412 }
  0x95   : > { %v415_v13 = vmul.f32 %v413_v11, %v400_v2  ;;  %v416_v14 = vmul.f32 %v413_v11, %v401_v3  ;;  %v417_v15 = vmul.f32 %v413_v11, %v402_v4  ;;  %v418_v16 = vmul.f32 %v413_v11, %v403_v5 }
  0x96   : > { %v419_v17 = vmul.f32 %v413_v11, %v404_v6  ;;  %v420_v18 = vmul.f32 %v413_v11, %v405_v7  ;;  %v421_v19 = vmul.f32 %v413_v11, %v406_v8  ;;  %v422_v20 = vmul.f32 %v413_v11, %v407_v9 }
  0x97   : > { %v423_v21 = vmul.f32 %v413_v11, %v408_v12  ;;  %v431_v22 = vmul.f32 %v3135_v10, %v415_v13  ;;  %v432_v23 = vmul.f32 %v3135_v10, %v416_v14  ;;  %v433_v24 = vmul.f32 %v3135_v10, %v417_v15 }
  0x98   : > { %v434_v25 = vmul.f32 %v3135_v10, %v418_v16  ;;  %v435_v26 = vmul.f32 %v3135_v10, %v419_v17  ;;  %v436_v27 = vmul.f32 %v3135_v10, %v420_v18  ;;  %v437_v28 = vmul.f32 %v3135_v10, %v421_v19 }
  0x99   : > { %v438_v29 = vmul.f32 %v3135_v10, %v422_v20  ;;  %v439_v30 = vmul.f32 %v3135_v10, %v423_v21  ;;  %441 = vst.msk [vmem:[#allocation2] sm:$0xf] %vm440_vm0, %v431_v22  ;;  %442 = vst.msk [vmem:[#allocation2 + $0x4] sm:$0xf] %vm440_vm0, %v432_v23 }
  0x9a   : > { %443 = vst.msk [vmem:[#allocation2 + $0x8] sm:$0xf] %vm440_vm0, %v433_v24  ;;  %444 = vst.msk [vmem:[#allocation2 + $0xc] sm:$0xf] %vm440_vm0, %v434_v25 }
  0x9b   : > { %445 = vst.msk [vmem:[#allocation2 + $0x10] sm:$0xf] %vm440_vm0, %v435_v26  ;;  %446 = vst.msk [vmem:[#allocation2 + $0x14] sm:$0xf] %vm440_vm0, %v436_v27 }
  0x9c   : > { %447 = vst.msk [vmem:[#allocation2 + $0x18] sm:$0xf] %vm440_vm0, %v437_v28  ;;  %448 = vst.msk [vmem:[#allocation2 + $0x1c] sm:$0xf] %vm440_vm0, %v438_v29 }
  0x9d   : > { %449 = vst.msk [vmem:[#allocation2 + $0x20] sm:$0xf] %vm440_vm0, %v439_v30 }
  0x9e PF: > { %vm659_vm1 = vcmask 1043456   ;;  %s583_s8 = smul.u32 144, %s4120_s21  ;;  %vm604_vm2 = vcmask 31744   ;;  %v4139_v15 = vmov 0   ;;  %v453_v26 = vld [vmem:[%s4223_s26 + $0x10] sm:$0xff]  ;;  %v451_v27 = vld [vmem:[%s4223_s26] sm:$0xff] }
  0x9f   : > { %4097 = vset.pattern.permute.xlu1 %v4139_v15  ;;  %4096 = vset.pattern.permute.xlu0 %v4139_v15  ;;  %v454_v28 = vld [vmem:[%s4223_s26 + $0x18] sm:$0xff]  ;;  %v452_v29 = vld [vmem:[%s4223_s26 + $0x8] sm:$0xff]  ;;  %vm2906_vm4 = vcmask 64512  }
  0xa0   : > { %v603_v32 = vld [vmem:[#allocation2] sm:$0xf]  ;;  %v857_v34 = vld [vmem:[#allocation2 + $0x4] sm:$0xf]  ;;  %s4277_s29 = scalar_lea.vmem %s4218_s16, %s583_s8  ;;  %487 = vperm.xlu1 %4097, %v453_v26   ;;  %477 = vperm.xlu0 %4096, %v451_v27  }
  0xa1   : > { %3625 = vmatprep.subr.msk.mxu1 %vm659_vm1, %v603_v32  ;;  %v585_v35 = vld [vmem:[%s4277_s29] sm:$0xff]  ;;  %v3267_v36 = vld [vmem:[%s4277_s29 + $0x13] sm:$0xff]  ;;  %v586_v37 = vld [vmem:[%s4277_s29 + $0x8] sm:$0xff] }
  0xa2   : > { %v4267_v31 = vld [vmem:[#allocation2 + $0x10] sm:$0xf]  ;;  %v1865_v33 = vld [vmem:[#allocation2 + $0x14] sm:$0xf]  ;;  %3626 = vmatpush3.msk.msra.mxu1 %vm659_vm1, %v603_v32  ;;  %3627 = vmatprep.mubr.msk.f32.mxu1 %vm604_vm2, %v585_v35  ;;  %v3268_v38 = vld [vmem:[%s4277_s29 + $0x1b] sm:$0xff] }
  0xa3   : > { %3741 = vmatprep.subr.msk.mxu0 %vm659_vm1, %v4267_v31  ;;  %3654 = vmatprep.subr.msk.mxu1 %vm659_vm1, %v857_v34  ;;  %v587_v39 = vld [vmem:[%s4277_s29 + $0x10] sm:$0xff]  ;;  %v3269_v40 = vld [vmem:[%s4277_s29 + $0x23] sm:$0xff]  ;;  %v2117_v41 = vld [vmem:[#allocation2 + $0x18] sm:$0xf] }
  0xa4   : > { %3742 = vmatpush3.msk.msra.mxu0 %vm659_vm1, %v4267_v31  ;;  %3743 = vmatprep.mubr.msk.f32.mxu0 %vm604_vm2, %v3267_v36  ;;  %v4291_v42 = vld [vmem:[#allocation2 + $0x8] sm:$0xf]  ;;  %v588_v43 = vld [vmem:[%s4277_s29 + $0x18] sm:$0xff]  ;;  %v589_v45 = vld [vmem:[%s4277_s29 + $0x20] sm:$0xff] }
  0xa5   : > { %3770 = vmatprep.subr.msk.mxu0 %vm659_vm1, %v1865_v33  ;;  %3628 = vmatmul.mubr.msk.f32.vlgmr.msra.gmra.mrb[0].mxu1 %vm604_vm2, %v586_v37  ;;  %v3270_v44 = vld [vmem:[%s4277_s29 + $0x2b] sm:$0xff]  ;;  %v3271_v46 = vld [vmem:[%s4277_s29 + $0x33] sm:$0xff]  ;;  %v3272_v48 = vld [vmem:[%s4277_s29 + $0x3b] sm:$0xff] }
  0xa6   : > { %3744 = vmatmul.mubr.msk.f32.vlgmr.msra.gmra.mrb[0].mxu0 %vm604_vm2, %v3268_v38  ;;  %3655 = vmatpush3.msk.msra.mxu1 %vm659_vm1, %v857_v34  ;;  %v590_v47 = vld [vmem:[%s4277_s29 + $0x28] sm:$0xff]  ;;  %v591_v49 = vld [vmem:[%s4277_s29 + $0x30] sm:$0xff]  ;;  %v592_v51 = vld [vmem:[%s4277_s29 + $0x38] sm:$0xff] }
  0xa7   : > { %3771 = vmatpush3.msk.msra.mxu0 %vm659_vm1, %v1865_v33  ;;  %3630 = vmatprep.mubr.msk.f32.mxu1 %vm604_vm2, %v587_v39  ;;  %v3273_v50 = vld [vmem:[%s4277_s29 + $0x43] sm:$0xff]  ;;  %v3274_v52 = vld [vmem:[%s4277_s29 + $0x4b] sm:$0xff]  ;;  %v3275_v54 = vld [vmem:[%s4277_s29 + $0x53] sm:$0xff] }
  0xa8   : > { %3746 = vmatprep.mubr.msk.f32.mxu0 %vm604_vm2, %v3269_v40  ;;  %3799 = vmatprep.subr.msk.mxu0 %vm659_vm1, %v2117_v41  ;;  %v593_v53 = vld [vmem:[%s4277_s29 + $0x40] sm:$0xff]  ;;  %v594_v55 = vld [vmem:[%s4277_s29 + $0x48] sm:$0xff]  ;;  %v595_v57 = vld [vmem:[%s4277_s29 + $0x50] sm:$0xff] }
  0xa9   : > { %3683 = vmatprep.subr.msk.mxu1 %vm659_vm1, %v4291_v42  ;;  %3631 = vmatmul.mubr.msk.f32.gmra.mrb[2].mxu1 %vm604_vm2, %v588_v43  ;;  %v3276_v56 = vld [vmem:[%s4277_s29 + $0x5b] sm:$0xff]  ;;  %v4336_v62 = vld [vmem:[%s4277_s29 + $0x24] sm:$0xff]  ;;  %v4346_v1 = vld [vmem:[%s4277_s29 + $0x2c] sm:$0xff] }
  0xaa   : > { %3747 = vmatmul.mubr.msk.f32.gmra.mrb[2].mxu0 %vm604_vm2, %v3270_v44  ;;  %3633 = vmatprep.mubr.msk.f32.mxu1 %vm604_vm2, %v589_v45  ;;  %v3304_v58 = vld [vmem:[%s4277_s29 + $0x14] sm:$0xff]  ;;  %v3305_v60 = vld [vmem:[%s4277_s29 + $0x1c] sm:$0xff]  ;;  %v598_v0 = vld [vmem:[%s4277_s29 + $0x68] sm:$0xff] }
  0xab   : > { %3749 = vmatprep.mubr.msk.f32.mxu0 %vm604_vm2, %v3271_v46  ;;  %v596_v59 = vld [vmem:[%s4277_s29 + $0x58] sm:$0xff]  ;;  %v597_v61 = vld [vmem:[%s4277_s29 + $0x60] sm:$0xff]  ;;  %v599_v2 = vld [vmem:[%s4277_s29 + $0x70] sm:$0xff]  ;;  %492 = vperm.xlu1 %4097, %v454_v28  }
  0xac   : > { %v4338_v63 = vld [vmem:[#allocation2 + $0x1c] sm:$0xf]  ;;  %v4352_v3 = vld [vmem:[%s4277_s29 + $0x34] sm:$0xff]  ;;  %v601_v6 = vld [vmem:[%s4277_s29 + $0x80] sm:$0xff]  ;;  %482 = vperm.xlu0 %4096, %v452_v29  }
  0xad   : > { %3634 = vmatmul.mubr.msk.f32.gmra.mrb[4].mxu1 %vm604_vm2, %v590_v47  ;;  %v600_v4 = vld [vmem:[%s4277_s29 + $0x78] sm:$0xff]  ;;  %v4368_v7 = vld [vmem:[%s4277_s29 + $0x44] sm:$0xff]  ;;  %v4378_v9 = vld [vmem:[%s4277_s29 + $0x4c] sm:$0xff] }
  0xae   : > { %3750 = vmatmul.mubr.msk.f32.gmra.mrb[4].mxu0 %vm604_vm2, %v3272_v48  ;;  %3636 = vmatprep.mubr.msk.f32.mxu1 %vm604_vm2, %v591_v49  ;;  %v4364_v5 = vld [vmem:[%s4277_s29 + $0x3c] sm:$0xff]  ;;  %v602_v8 = vld [vmem:[%s4277_s29 + $0x88] sm:$0xff]  ;;  %v4382_v11 = vld [vmem:[%s4277_s29 + $0x54] sm:$0xff] }
  0xaf   : > { %3752 = vmatprep.mubr.msk.f32.mxu0 %vm604_vm2, %v3273_v50  ;;  %v3156_v10 = vld [vmem:[%s4277_s29 + $0x1] sm:$0xff]  ;;  %v3157_v12 = vld [vmem:[%s4277_s29 + $0x9] sm:$0xff]  ;;  %v3158_v14 = vld [vmem:[%s4277_s29 + $0x11] sm:$0xff] }
  0xb0   : > { %v4392_v13 = vld [vmem:[%s4277_s29 + $0x5c] sm:$0xff]  ;;  %v4396_v16 = vld [vmem:[%s4277_s29 + $0x64] sm:$0xff]  ;;  %v4398_v17 = vld [vmem:[#allocation2 + $0xc] sm:$0xf] }
  0xb1   : > { %3637 = vmatmul.mubr.msk.f32.gmra.mrb[6].mxu1 %vm604_vm2, %v592_v51  ;;  %v3159_v18 = vld [vmem:[%s4277_s29 + $0x19] sm:$0xff]  ;;  %v4408_v19 = vld [vmem:[%s4277_s29 + $0x6c] sm:$0xff]  ;;  %v3160_v20 = vld [vmem:[%s4277_s29 + $0x21] sm:$0xff] }
  0xb2   : > { %3753 = vmatmul.mubr.msk.f32.gmra.mrb[6].mxu0 %vm604_vm2, %v3274_v52  ;;  %3639 = vmatprep.mubr.msk.f32.mxu1 %vm604_vm2, %v593_v53  ;;  %v4414_v21 = vld [vmem:[%s4277_s29 + $0x74] sm:$0xff]  ;;  %v3161_v22 = vld [vmem:[%s4277_s29 + $0x29] sm:$0xff]  ;;  %v4426_v23 = vld [vmem:[%s4277_s29 + $0x7c] sm:$0xff] }
  0xb3   : > { %3755 = vmatprep.mubr.msk.f32.mxu0 %vm604_vm2, %v3275_v54  ;;  %v3162_v24 = vld [vmem:[%s4277_s29 + $0x31] sm:$0xff]  ;;  %v4430_v25 = vld [vmem:[%s4277_s29 + $0x84] sm:$0xff]  ;;  %v3163_v30 = vld [vmem:[%s4277_s29 + $0x39] sm:$0xff] }
  0xb4   : > { %v4444_v32 = vld [vmem:[%s4277_s29 + $0x8c] sm:$0xff]  ;;  %v3164_v33 = vld [vmem:[%s4277_s29 + $0x41] sm:$0xff]  ;;  %v4448_v34 = vld [vmem:[%s4277_s29 + $0x94] sm:$0xff] }
  0xb5   : > { %3640 = vmatmul.mubr.msk.f32.gmra.mrb[8].mxu1 %vm604_vm2, %v594_v55  ;;  %v456_v35 = vld [vmem:[%s4223_s26 + $0x28] sm:$0xff]  ;;  %v455_v36 = vld [vmem:[%s4223_s26 + $0x20] sm:$0xff]  ;;  %v3166_v39 = vld [vmem:[%s4277_s29 + $0x51] sm:$0xff] }
  0xb6   : > { %3756 = vmatmul.mubr.msk.f32.gmra.mrb[8].mxu0 %vm604_vm2, %v3276_v56  ;;  %3642 = vmatprep.mubr.msk.f32.mxu1 %vm604_vm2, %v595_v57  ;;  %v3165_v37 = vld [vmem:[%s4277_s29 + $0x49] sm:$0xff]  ;;  %v4460_v38 = vld [vmem:[%s4277_s29 + $0x9c] sm:$0xff]  ;;  %v3170_v48 = vld [vmem:[%s4277_s29 + $0x71] sm:$0xff] }
  0xb7   : > { %3772 = vmatprep.mubr.msk.f32.mxu0 %vm604_vm2, %v3304_v58  ;;  %502 = vperm.xlu1 %4097, %v456_v35   ;;  %v458_v40 = vld [vmem:[%s4223_s26 + $0x38] sm:$0xff]  ;;  %v3168_v43 = vld [vmem:[%s4277_s29 + $0x61] sm:$0xff]  ;;  %v3169_v47 = vld [vmem:[%s4277_s29 + $0x69] sm:$0xff] }
  0xb8   : > { %497 = vperm.xlu0 %4096, %v455_v36   ;;  %v4473_v44 = vld [vmem:[#allocation2 + $0x20] sm:$0xf]  ;;  %v460_v45 = vld [vmem:[%s4223_s26 + $0x48] sm:$0xff]  ;;  %v462_v49 = vld [vmem:[%s4223_s26 + $0x58] sm:$0xff] }
  0xb9   : > { %3643 = vmatmul.mubr.msk.f32.gmra.mrb[10].mxu1 %vm604_vm2, %v596_v59  ;;  %v459_v46 = vld [vmem:[%s4223_s26 + $0x40] sm:$0xff]  ;;  %v461_v50 = vld [vmem:[%s4223_s26 + $0x50] sm:$0xff]  ;;  %v464_v53 = vld [vmem:[%s4223_s26 + $0x68] sm:$0xff] }
  0xba   : > { %3773 = vmatmul.mubr.msk.f32.vlgmr.msra.gmra.mrb[0].mxu0 %vm604_vm2, %v3305_v60  ;;  %3645 = vmatprep.mubr.msk.f32.mxu1 %vm604_vm2, %v597_v61  ;;  %v3171_v51 = vld [vmem:[%s4277_s29 + $0x79] sm:$0xff]  ;;  %v3172_v52 = vld [vmem:[%s4277_s29 + $0x81] sm:$0xff]  ;;  %v3173_v55 = vld [vmem:[%s4277_s29 + $0x89] sm:$0xff] }
  0xbb   : > { %3800 = vmatpush3.msk.msra.mxu0 %vm659_vm1, %v2117_v41  ;;  %3775 = vmatprep.mubr.msk.f32.mxu0 %vm604_vm2, %v4336_v62  ;;  %v457_v41 = vld [vmem:[%s4223_s26 + $0x30] sm:$0xff]  ;;  %v463_v54 = vld [vmem:[%s4223_s26 + $0x60] sm:$0xff]  ;;  %v466_v57 = vld [vmem:[%s4223_s26 + $0x78] sm:$0xff] }
  0xbc   : > { %3828 = vmatprep.subr.msk.mxu0 %vm659_vm1, %v4338_v63  ;;  %512 = vperm.xlu1 %4097, %v458_v40   ;;  %v3193_v56 = vld [vmem:[%s4277_s29 + $0x2] sm:$0xff]  ;;  %v465_v58 = vld [vmem:[%s4223_s26 + $0x70] sm:$0xff] }
  0xbd   : > { %3646 = vmatmul.mubr.msk.f32.gmra.mrb[12].mxu1 %vm604_vm2, %v598_v0  ;;  %507 = vperm.xlu0 %4096, %v457_v41   ;;  %v3194_v59 = vld [vmem:[%s4277_s29 + $0xa] sm:$0xff]  ;;  %v4519_v60 = vld [vmem:[%s4277_s29 + $0x12] sm:$0xff]  ;;  %v4536_v0 = vld [vmem:[%s4277_s29 + $0x22] sm:$0xff] }
  0xbe   : > { %3776 = vmatmul.mubr.msk.f32.gmra.mrb[2].mxu0 %vm604_vm2, %v4346_v1  ;;  %3648 = vmatprep.mubr.msk.f32.mxu1 %vm604_vm2, %v599_v2  ;;  %v468_v61 = vld [vmem:[%s4223_s26 + $0x88] sm:$0xff]  ;;  %v4550_v2 = vld [vmem:[%s4277_s29 + $0x32] sm:$0xff]  ;;  %v3381_v15 = vld [vmem:[%s4277_s29 + $0x3d] sm:$0xff] }
  0xbf   : > { %3778 = vmatprep.mubr.msk.f32.mxu0 %vm604_vm2, %v4352_v3  ;;  %v3388_v26 = vld [vmem:[%s4277_s29 + $0x75] sm:$0xff]  ;;  %v3389_v27 = vld [vmem:[%s4277_s29 + $0x7d] sm:$0xff]  ;;  %v3390_v28 = vld [vmem:[%s4277_s29 + $0x85] sm:$0xff] }
  0xc0   : > { %522 = vperm.xlu1 %4097, %v460_v45   ;;  %v3392_v29 = vld [vmem:[%s4277_s29 + $0x95] sm:$0xff]  ;;  %v3423_v45 = vld [vmem:[%s4277_s29 + $0x66] sm:$0xff] }
  0xc1   : > { %3649 = vmatmul.mubr.msk.f32.gmra.mrb[14].mxu1 %vm604_vm2, %v600_v4  ;;  %517 = vperm.xlu0 %4096, %v459_v46   ;;  %v4561_v4 = vld [vmem:[%s4277_s29 + $0x42] sm:$0xff]  ;;  %v3416_v35 = vld [vmem:[%s4277_s29 + $0x2e] sm:$0xff]  ;;  %v3417_v36 = vld [vmem:[%s4277_s29 + $0x36] sm:$0xff] }
  0xc2   : > { %3779 = vmatmul.mubr.msk.f32.gmra.mrb[4].mxu0 %vm604_vm2, %v4364_v5  ;;  %3651 = vmatprep.mubr.msk.f32.mxu1 %vm604_vm2, %v601_v6  ;;  %v3202_v6 = vld [vmem:[%s4277_s29 + $0x4a] sm:$0xff]  ;;  %v3246_v40 = vld [vmem:[%s4277_s29 + $0x92] sm:$0xff] }
  0xc3   : > { %3781 = vmatprep.mubr.msk.f32.mxu0 %vm604_vm2, %v4368_v7  ;;  %v3421_v41 = vld [vmem:[%s4277_s29 + $0x56] sm:$0xff]  ;;  %v3278_v46 = vld [vmem:[%s4277_s29 + $0x6b] sm:$0xff] }
  0xc4   : > { %532 = vperm.xlu1 %4097, %v462_v49   ;;  %v3425_v49 = vld [vmem:[%s4277_s29 + $0x76] sm:$0xff] }
  0xc5   : > { %3652 = vmatmul.mubr.msk.f32.gmra.mrb[16].mxu1 %vm604_vm2, %v602_v8  ;;  %527 = vperm.xlu0 %4096, %v461_v50   ;;  %v3203_v8 = vld [vmem:[%s4277_s29 + $0x52] sm:$0xff]  ;;  %v3280_v50 = vld [vmem:[%s4277_s29 + $0x7b] sm:$0xff] }
  0xc6   : > { %3782 = vmatmul.mubr.msk.f32.gmra.mrb[6].mxu0 %vm604_vm2, %v4378_v9  ;;  %3656 = vmatprep.mubr.msk.f32.mxu1 %vm604_vm2, %v3156_v10  ;;  %v3204_v10 = vld [vmem:[%s4277_s29 + $0x5a] sm:$0xff] }
  0xc7   : > { %3784 = vmatprep.mubr.msk.f32.mxu0 %vm604_vm2, %v4382_v11 }
  0xc8   : > { %542 = vperm.xlu1 %4097, %v464_v53   ;;  %v3427_v53 = vld [vmem:[%s4277_s29 + $0x86] sm:$0xff] }
  0xc9   : > { %3657 = vmatmul.mubr.msk.f32.vlgmr.msra.gmra.mrb[0].mxu1 %vm604_vm2, %v3157_v12  ;;  %537 = vperm.xlu0 %4096, %v463_v54   ;;  %v3205_v12 = vld [vmem:[%s4277_s29 + $0x62] sm:$0xff]  ;;  %v3282_v54 = vld [vmem:[%s4277_s29 + $0x8b] sm:$0xff] }
  0xca   : > { %3785 = vmatmul.mubr.msk.f32.gmra.mrb[8].mxu0 %vm604_vm2, %v4392_v13  ;;  %3684 = vmatpush3.msk.msra.mxu1 %vm659_vm1, %v4291_v42  ;;  %v3167_v42 = vld [vmem:[%s4277_s29 + $0x59] sm:$0xff] }
  0xcb   : > { %3659 = vmatprep.mubr.msk.f32.mxu1 %vm604_vm2, %v3158_v14  ;;  %3787 = vmatprep.mubr.msk.f32.mxu0 %vm604_vm2, %v4396_v16  ;;  %v3206_v14 = vld [vmem:[%s4277_s29 + $0x6a] sm:$0xff] }
  0xcc   : > { %3712 = vmatprep.subr.msk.mxu1 %vm659_vm1, %v4398_v17  ;;  %552 = vperm.xlu1 %4097, %v466_v57   ;;  %v3429_v57 = vld [vmem:[%s4277_s29 + $0x96] sm:$0xff] }
  0xcd   : > { %3660 = vmatmul.mubr.msk.f32.gmra.mrb[2].mxu1 %vm604_vm2, %v3159_v18  ;;  %547 = vperm.xlu0 %4096, %v465_v58   ;;  %v3208_v18 = vld [vmem:[%s4277_s29 + $0x7a] sm:$0xff] }
  0xce   : > { %3788 = vmatmul.mubr.msk.f32.gmra.mrb[10].mxu0 %vm604_vm2, %v4408_v19  ;;  %3662 = vmatprep.mubr.msk.f32.mxu1 %vm604_vm2, %v3160_v20  ;;  %v3209_v20 = vld [vmem:[%s4277_s29 + $0x82] sm:$0xff] }
  0xcf   : > { %3790 = vmatprep.mubr.msk.f32.mxu0 %vm604_vm2, %v4414_v21  ;;  %v3284_v58 = vld [vmem:[%s4277_s29 + $0x9b] sm:$0xff] }
  0xd0   : > { %562 = vperm.xlu1 %4097, %v468_v61   ;;  %v3432_v61 = vld [vmem:[%s4277_s29 + $0xae] sm:$0xff] }
  0xd1   : > { %3663 = vmatmul.mubr.msk.f32.gmra.mrb[4].mxu1 %vm604_vm2, %v3161_v22  ;;  %v3210_v22 = vld [vmem:[%s4277_s29 + $0x8a] sm:$0xff] }
  0xd2   : > { %3791 = vmatmul.mubr.msk.f32.gmra.mrb[12].mxu0 %vm604_vm2, %v4426_v23  ;;  %3665 = vmatprep.mubr.msk.f32.mxu1 %vm604_vm2, %v3162_v24  ;;  %v3386_v24 = vld [vmem:[%s4277_s29 + $0x65] sm:$0xff] }
  0xd3   : > { %3793 = vmatprep.mubr.msk.f32.mxu0 %vm604_vm2, %v4430_v25 }
  0xd5   : > { %3666 = vmatmul.mubr.msk.f32.gmra.mrb[6].mxu1 %vm604_vm2, %v3163_v30  ;;  %v3393_v30 = vld [vmem:[%s4277_s29 + $0x9d] sm:$0xff] }
  0xd6   : > { %3794 = vmatmul.mubr.msk.f32.gmra.mrb[14].mxu0 %vm604_vm2, %v4444_v32  ;;  %3668 = vmatprep.mubr.msk.f32.mxu1 %vm604_vm2, %v3164_v33  ;;  %v3395_v33 = vld [vmem:[%s4277_s29 + $0xad] sm:$0xff] }
  0xd7   : > { %3796 = vmatprep.mubr.msk.f32.mxu0 %vm604_vm2, %v4448_v34 }
  0xd9   : > { %3669 = vmatmul.mubr.msk.f32.gmra.mrb[8].mxu1 %vm604_vm2, %v3165_v37  ;;  %v3418_v37 = vld [vmem:[%s4277_s29 + $0x3e] sm:$0xff] }
  0xda   : > { %3797 = vmatmul.mubr.msk.f32.gmra.mrb[16].mxu0 %vm604_vm2, %v4460_v38  ;;  %3671 = vmatprep.mubr.msk.f32.mxu1 %vm604_vm2, %v3166_v39  ;;  %v3420_v39 = vld [vmem:[%s4277_s29 + $0x4e] sm:$0xff] }
  0xdb   : > { %3801 = vmatprep.mubr.msk.f32.mxu0 %vm604_vm2, %v4336_v62  ;;  %v467_v62 = vld [vmem:[%s4223_s26 + $0x80] sm:$0xff] }
  0xdc   : > { %557 = vperm.xlu0 %4096, %v467_v62  }
  0xdd   : > { %3672 = vmatmul.mubr.msk.f32.gmra.mrb[10].mxu1 %vm604_vm2, %v3167_v42  ;;  %v3247_v42 = vld [vmem:[%s4277_s29 + $0x9a] sm:$0xff] }
  0xde   : > { %3802 = vmatmul.mubr.msk.f32.vlgmr.msra.gmra.mrb[0].mxu0 %vm604_vm2, %v4346_v1  ;;  %3674 = vmatprep.mubr.msk.f32.mxu1 %vm604_vm2, %v3168_v43  ;;  %v3198_v1 = vld [vmem:[%s4277_s29 + $0x2a] sm:$0xff]  ;;  %v3422_v43 = vld [vmem:[%s4277_s29 + $0x5e] sm:$0xff] }
  0xdf   : > { %3829 = vmatpush3.msk.msra.mxu0 %vm659_vm1, %v4338_v63  ;;  %3804 = vmatprep.mubr.msk.f32.mxu0 %vm604_vm2, %v4352_v3  ;;  %v4531_v63 = vld [vmem:[%s4277_s29 + $0x1a] sm:$0xff] }
  0xe0   : > { %3857 = vmatprep.subr.msk.mxu0 %vm659_vm1, %v4473_v44  ;;  %v3200_v3 = vld [vmem:[%s4277_s29 + $0x3a] sm:$0xff] }
  0xe1   : > { %3675 = vmatmul.mubr.msk.f32.gmra.mrb[12].mxu1 %vm604_vm2, %v3169_v47  ;;  %v3424_v47 = vld [vmem:[%s4277_s29 + $0x6e] sm:$0xff] }
  0xe2   : > { %3805 = vmatmul.mubr.msk.f32.gmra.mrb[2].mxu0 %vm604_vm2, %v4364_v5  ;;  %3677 = vmatprep.mubr.msk.f32.mxu1 %vm604_vm2, %v3170_v48  ;;  %v3357_v5 = vld [vmem:[%s4277_s29 + $0xa4] sm:$0xff]  ;;  %v3279_v48 = vld [vmem:[%s4277_s29 + $0x73] sm:$0xff] }
  0xe3   : > { %3807 = vmatprep.mubr.msk.f32.mxu0 %vm604_vm2, %v4368_v7  ;;  %v3358_v7 = vld [vmem:[%s4277_s29 + $0xac] sm:$0xff] }
  0xe5   : > { %3678 = vmatmul.mubr.msk.f32.gmra.mrb[14].mxu1 %vm604_vm2, %v3171_v51  ;;  %v3426_v51 = vld [vmem:[%s4277_s29 + $0x7e] sm:$0xff] }
  0xe6   : > { %3808 = vmatmul.mubr.msk.f32.gmra.mrb[4].mxu0 %vm604_vm2, %v4378_v9  ;;  %3680 = vmatprep.mubr.msk.f32.mxu1 %vm604_vm2, %v3172_v52  ;;  %v3378_v9 = vld [vmem:[%s4277_s29 + $0x25] sm:$0xff] }
  0xe7   : > { %3810 = vmatprep.mubr.msk.f32.mxu0 %vm604_vm2, %v4382_v11  ;;  %v3379_v11 = vld [vmem:[%s4277_s29 + $0x2d] sm:$0xff]  ;;  %v3281_v52 = vld [vmem:[%s4277_s29 + $0x83] sm:$0xff] }
  0xe9   : > { %3681 = vmatmul.mubr.msk.f32.gmra.mrb[16].mxu1 %vm604_vm2, %v3173_v55  ;;  %v3428_v55 = vld [vmem:[%s4277_s29 + $0x8e] sm:$0xff] }
  0xea   : > { %3811 = vmatmul.mubr.msk.f32.gmra.mrb[6].mxu0 %vm604_vm2, %v4392_v13  ;;  %3685 = vmatprep.mubr.msk.f32.mxu1 %vm604_vm2, %v3193_v56  ;;  %v3380_v13 = vld [vmem:[%s4277_s29 + $0x35] sm:$0xff] }
  0xeb   : > { %3813 = vmatprep.mubr.msk.f32.mxu0 %vm604_vm2, %v4396_v16  ;;  %v3207_v16 = vld [vmem:[%s4277_s29 + $0x72] sm:$0xff] }
  0xec   : > { %v3283_v56 = vld [vmem:[%s4277_s29 + $0x93] sm:$0xff] }
  0xed   : > { %3686 = vmatmul.mubr.msk.f32.vlgmr.msra.gmra.mrb[0].mxu1 %vm604_vm2, %v3194_v59  ;;  %v3430_v59 = vld [vmem:[%s4277_s29 + $0x9e] sm:$0xff] }
  0xee   : > { %3814 = vmatmul.mubr.msk.f32.gmra.mrb[8].mxu0 %vm604_vm2, %v4408_v19  ;;  %3713 = vmatpush3.msk.msra.mxu1 %vm659_vm1, %v4398_v17  ;;  %v3382_v17 = vld [vmem:[%s4277_s29 + $0x45] sm:$0xff]  ;;  %v3383_v19 = vld [vmem:[%s4277_s29 + $0x4d] sm:$0xff] }
  0xef   : > { %3688 = vmatprep.mubr.msk.f32.mxu1 %vm604_vm2, %v4519_v60  ;;  %3816 = vmatprep.mubr.msk.f32.mxu0 %vm604_vm2, %v4414_v21  ;;  %v3384_v21 = vld [vmem:[%s4277_s29 + $0x55] sm:$0xff] }
  0xf0   : > { %3886 = vmatprep.subr.msk.mxu1 %vm659_vm1, %v4267_v31 }
  0xf1   : > { %3689 = vmatmul.mubr.msk.f32.gmra.mrb[2].mxu1 %vm604_vm2, %v4531_v63 }
  0xf2   : > { %3817 = vmatmul.mubr.msk.f32.gmra.mrb[10].mxu0 %vm604_vm2, %v4426_v23  ;;  %3691 = vmatprep.mubr.msk.f32.mxu1 %vm604_vm2, %v4536_v0  ;;  %v3385_v23 = vld [vmem:[%s4277_s29 + $0x5d] sm:$0xff] }
  0xf3   : > { %3819 = vmatprep.mubr.msk.f32.mxu0 %vm604_vm2, %v4430_v25  ;;  %v3387_v25 = vld [vmem:[%s4277_s29 + $0x6d] sm:$0xff] }
  0xf5   : > { %3692 = vmatmul.mubr.msk.f32.gmra.mrb[4].mxu1 %vm604_vm2, %v3198_v1 }
  0xf6   : > { %3820 = vmatmul.mubr.msk.f32.gmra.mrb[12].mxu0 %vm604_vm2, %v4444_v32  ;;  %3694 = vmatprep.mubr.msk.f32.mxu1 %vm604_vm2, %v4550_v2  ;;  %v3394_v32 = vld [vmem:[%s4277_s29 + $0xa5] sm:$0xff] }
  0xf7   : > { %3822 = vmatprep.mubr.msk.f32.mxu0 %vm604_vm2, %v4448_v34  ;;  %v3415_v34 = vld [vmem:[%s4277_s29 + $0x26] sm:$0xff] }
  0xf9   : > { %3695 = vmatmul.mubr.msk.f32.gmra.mrb[6].mxu1 %vm604_vm2, %v3200_v3 }
  0xfa   : > { %3823 = vmatmul.mubr.msk.f32.gmra.mrb[14].mxu0 %vm604_vm2, %v4460_v38  ;;  %3697 = vmatprep.mubr.msk.f32.mxu1 %vm604_vm2, %v4561_v4  ;;  %v3419_v38 = vld [vmem:[%s4277_s29 + $0x46] sm:$0xff] }
  0xfb   : > { %3825 = vmatprep.mubr.msk.f32.mxu0 %vm604_vm2, %v3357_v5 }
  0xfd   : > { %3698 = vmatmul.mubr.msk.f32.gmra.mrb[8].mxu1 %vm604_vm2, %v3202_v6 }
  0xfe   : > { %3826 = vmatmul.mubr.msk.f32.gmra.mrb[16].mxu0 %vm604_vm2, %v3358_v7  ;;  %3700 = vmatprep.mubr.msk.f32.mxu1 %vm604_vm2, %v3203_v8 }
  0xff   : > { %3830 = vmatprep.mubr.msk.f32.mxu0 %vm604_vm2, %v3378_v9 }
 0x101   : > { %3701 = vmatmul.mubr.msk.f32.gmra.mrb[10].mxu1 %vm604_vm2, %v3204_v10 }
 0x102   : > { %3831 = vmatmul.mubr.msk.f32.vlgmr.msra.gmra.mrb[0].mxu0 %vm604_vm2, %v3379_v11  ;;  %3703 = vmatprep.mubr.msk.f32.mxu1 %vm604_vm2, %v3205_v12 }
 0x103   : > { %3858 = vmatpush3.msk.msra.mxu0 %vm659_vm1, %v4473_v44  ;;  %3833 = vmatprep.mubr.msk.f32.mxu0 %vm604_vm2, %v3380_v13  ;;  %v3277_v44 = vld [vmem:[%s4277_s29 + $0x63] sm:$0xff] }
 0x105   : > { %3704 = vmatmul.mubr.msk.f32.gmra.mrb[12].mxu1 %vm604_vm2, %v3206_v14 }
 0x106   : > { %3834 = vmatmul.mubr.msk.f32.gmra.mrb[2].mxu0 %vm604_vm2, %v3381_v15  ;;  %3706 = vmatprep.mubr.msk.f32.mxu1 %vm604_vm2, %v3207_v16 }
 0x107   : > { %3836 = vmatprep.mubr.msk.f32.mxu0 %vm604_vm2, %v3382_v17 }
 0x109   : > { %3707 = vmatmul.mubr.msk.f32.gmra.mrb[14].mxu1 %vm604_vm2, %v3208_v18 }
 0x10a   : > { %3837 = vmatmul.mubr.msk.f32.gmra.mrb[4].mxu0 %vm604_vm2, %v3383_v19  ;;  %3709 = vmatprep.mubr.msk.f32.mxu1 %vm604_vm2, %v3209_v20 }
 0x10b   : > { %3839 = vmatprep.mubr.msk.f32.mxu0 %vm604_vm2, %v3384_v21 }
 0x10d   : > { %3710 = vmatmul.mubr.msk.f32.gmra.mrb[16].mxu1 %vm604_vm2, %v3210_v22 }
 0x10e   : > { %3840 = vmatmul.mubr.msk.f32.gmra.mrb[6].mxu0 %vm604_vm2, %v3385_v23  ;;  %3714 = vmatprep.mubr.msk.f32.mxu1 %vm604_vm2, %v4519_v60  ;;  %v3431_v60 = vld [vmem:[%s4277_s29 + $0xa6] sm:$0xff] }
 0x10f   : > { %3842 = vmatprep.mubr.msk.f32.mxu0 %vm604_vm2, %v3386_v24 }
 0x111   : > { %3715 = vmatmul.mubr.msk.f32.vlgmr.msra.gmra.mrb[0].mxu1 %vm604_vm2, %v4531_v63 }
 0x112   : > { %3843 = vmatmul.mubr.msk.f32.gmra.mrb[8].mxu0 %vm604_vm2, %v3387_v25  ;;  %3887 = vmatpush3.msk.msra.mxu1 %vm659_vm1, %v4267_v31  ;;  %v3391_v31 = vld [vmem:[%s4277_s29 + $0x8d] sm:$0xff] }
 0x113   : > { %3717 = vmatprep.mubr.msk.f32.mxu1 %vm604_vm2, %v4536_v0  ;;  %3845 = vmatprep.mubr.msk.f32.mxu0 %vm604_vm2, %v3388_v26 }
 0x115   : > { %3718 = vmatmul.mubr.msk.f32.gmra.mrb[2].mxu1 %vm604_vm2, %v3198_v1 }
 0x116   : > { %3846 = vmatmul.mubr.msk.f32.gmra.mrb[10].mxu0 %vm604_vm2, %v3389_v27  ;;  %3720 = vmatprep.mubr.msk.f32.mxu1 %vm604_vm2, %v4550_v2 }
 0x117   : > { %3848 = vmatprep.mubr.msk.f32.mxu0 %vm604_vm2, %v3390_v28 }
 0x119   : > { %3721 = vmatmul.mubr.msk.f32.gmra.mrb[4].mxu1 %vm604_vm2, %v3200_v3 }
 0x11a   : > { %3849 = vmatmul.mubr.msk.f32.gmra.mrb[12].mxu0 %vm604_vm2, %v3391_v31  ;;  %3723 = vmatprep.mubr.msk.f32.mxu1 %vm604_vm2, %v4561_v4 }
 0x11b   : > { %3851 = vmatprep.mubr.msk.f32.mxu0 %vm604_vm2, %v3392_v29 }
 0x11d   : > { %3724 = vmatmul.mubr.msk.f32.gmra.mrb[6].mxu1 %vm604_vm2, %v3202_v6 }
 0x11e   : > { %3852 = vmatmul.mubr.msk.f32.gmra.mrb[14].mxu0 %vm604_vm2, %v3393_v30  ;;  %3726 = vmatprep.mubr.msk.f32.mxu1 %vm604_vm2, %v3203_v8 }
 0x11f   : > { %3854 = vmatprep.mubr.msk.f32.mxu0 %vm604_vm2, %v3394_v32  ;;  %v488_v62 = vpop.permute.xlu1 %487  ;;  %v478_v63 = vpop.permute.xlu0 %477 }
 0x121   : > { %3727 = vmatmul.mubr.msk.f32.gmra.mrb[8].mxu1 %vm604_vm2, %v3204_v10  ;;  %v4710_v10 = vld [vmem:[%s4790_s3] ss:$0 sm:$0xff] }
 0x122   : > { %3855 = vmatmul.mubr.msk.f32.gmra.mrb[16].mxu0 %vm604_vm2, %v3395_v33  ;;  %3729 = vmatprep.mubr.msk.f32.mxu1 %vm604_vm2, %v3205_v12  ;;  %v567_v21 = vadd.f32 %v4710_v10, %v488_v62 }
 0x123   : > { %3859 = vmatprep.mubr.msk.f32.mxu0 %vm604_vm2, %v3415_v34 }
 0x125   : > { %3730 = vmatmul.mubr.msk.f32.gmra.mrb[10].mxu1 %vm604_vm2, %v3206_v14 }
 0x126   : > { %3860 = vmatmul.mubr.msk.f32.vlgmr.msra.gmra.mrb[0].mxu0 %vm604_vm2, %v3416_v35  ;;  %3732 = vmatprep.mubr.msk.f32.mxu1 %vm604_vm2, %v3207_v16  ;;  %v565_v16 = vadd.f32 %v4710_v10, %v478_v63 }
 0x127   : > { %3862 = vmatprep.mubr.msk.f32.mxu0 %vm604_vm2, %v3417_v36 }
 0x129   : > { %3733 = vmatmul.mubr.msk.f32.gmra.mrb[12].mxu1 %vm604_vm2, %v3208_v18 }
 0x12a   : > { %3863 = vmatmul.mubr.msk.f32.gmra.mrb[2].mxu0 %vm604_vm2, %v3418_v37  ;;  %3735 = vmatprep.mubr.msk.f32.mxu1 %vm604_vm2, %v3209_v20  ;;  %v493_v2 = vpop.permute.xlu1 %492 }
 0x12b   : > { %3865 = vmatprep.mubr.msk.f32.mxu0 %vm604_vm2, %v3419_v38  ;;  %v483_v3 = vpop.permute.xlu0 %482  ;;  %v568_v19 = vadd.f32 %v4710_v10, %v493_v2 }
 0x12c   : > { %v566_v14 = vadd.f32 %v4710_v10, %v483_v3 }
 0x12d   : > { %3736 = vmatmul.mubr.msk.f32.gmra.mrb[14].mxu1 %vm604_vm2, %v3210_v22 }
 0x12e   : > { %3866 = vmatmul.mubr.msk.f32.gmra.mrb[4].mxu0 %vm604_vm2, %v3420_v39  ;;  %3738 = vmatprep.mubr.msk.f32.mxu1 %vm604_vm2, %v3246_v40 }
 0x12f   : > { %3868 = vmatprep.mubr.msk.f32.mxu0 %vm604_vm2, %v3421_v41 }
 0x131   : > { %3739 = vmatmul.mubr.msk.f32.gmra.mrb[16].mxu1 %vm604_vm2, %v3247_v42 }
 0x132   : > { %3869 = vmatmul.mubr.msk.f32.gmra.mrb[6].mxu0 %vm604_vm2, %v3422_v43  ;;  %3758 = vmatprep.mubr.msk.f32.mxu1 %vm604_vm2, %v3277_v44 }
 0x133   : > { %3871 = vmatprep.mubr.msk.f32.mxu0 %vm604_vm2, %v3423_v45 }
 0x135   : > { %3759 = vmatmul.mubr.msk.f32.vlgmr.msra.gmra.mrb[10].mxu1 %vm604_vm2, %v3278_v46 }
 0x136   : > { %3872 = vmatmul.mubr.msk.f32.gmra.mrb[8].mxu0 %vm604_vm2, %v3424_v47  ;;  %3761 = vmatprep.mubr.msk.f32.mxu1 %vm604_vm2, %v3279_v48  ;;  %v503_v6 = vpop.permute.xlu1 %502 }
 0x137   : > { %3874 = vmatprep.mubr.msk.f32.mxu0 %vm604_vm2, %v3425_v49  ;;  %v498_v8 = vpop.permute.xlu0 %497  ;;  %v570_v28 = vadd.f32 %v4710_v10, %v503_v6 }
 0x138   : > { %v569_v32 = vadd.f32 %v4710_v10, %v498_v8 }
 0x139   : > { %3762 = vmatmul.mubr.msk.f32.gmra.mrb[12].mxu1 %vm604_vm2, %v3280_v50 }
 0x13a   : > { %3875 = vmatmul.mubr.msk.f32.gmra.mrb[10].mxu0 %vm604_vm2, %v3426_v51  ;;  %3764 = vmatprep.mubr.msk.f32.mxu1 %vm604_vm2, %v3281_v52 }
 0x13b   : > { %3877 = vmatprep.mubr.msk.f32.mxu0 %vm604_vm2, %v3427_v53  ;;  %v513_v13 = vpop.permute.xlu1 %512 }
 0x13c   : > { %v508_v15 = vpop.permute.xlu0 %507  ;;  %v572_v42 = vadd.f32 %v4710_v10, %v513_v13 }
 0x13d   : > { %3765 = vmatmul.mubr.msk.f32.gmra.mrb[14].mxu1 %vm604_vm2, %v3282_v54  ;;  %v571_v46 = vadd.f32 %v4710_v10, %v508_v15 }
 0x13e   : > { %3878 = vmatmul.mubr.msk.f32.gmra.mrb[12].mxu0 %vm604_vm2, %v3428_v55  ;;  %3767 = vmatprep.mubr.msk.f32.mxu1 %vm604_vm2, %v3283_v56 }
 0x13f   : > { %3880 = vmatprep.mubr.msk.f32.mxu0 %vm604_vm2, %v3429_v57  ;;  %v523_v23 = vpop.permute.xlu1 %522 }
 0x140   : > { %v518_v25 = vpop.permute.xlu0 %517  ;;  %v574_v55 = vadd.f32 %v4710_v10, %v523_v23 }
 0x141   : > { %3768 = vmatmul.mubr.msk.f32.gmra.mrb[16].mxu1 %vm604_vm2, %v3284_v58  ;;  %v573_v58 = vadd.f32 %v4710_v10, %v518_v25 }
 0x142   : > { %3881 = vmatmul.mubr.msk.f32.gmra.mrb[14].mxu0 %vm604_vm2, %v3430_v59 }
 0x143   : > { %3883 = vmatprep.mubr.msk.f32.mxu0 %vm604_vm2, %v3431_v60  ;;  %v533_v39 = vpop.permute.xlu1 %532 }
 0x144   : > { %v528_v43 = vpop.permute.xlu0 %527 }
 0x146   : > { %3884 = vmatmul.mubr.msk.f32.gmra.mrb[16].mxu0 %vm604_vm2, %v3432_v61 }
 0x147   : > { %v543_v59 = vpop.permute.xlu1 %542 }
 0x148   : > { %v538_v63 = vpop.permute.xlu0 %537 }
 0x1e4   : > { %v3716_v0 = vpop.f32.mrb[0].mxu1 }
 0x1e5   : > { %v1485_v1 = vpop.f32.mrb[1].mxu1  ;;  %v3888_v20 = vadd.f32 %v3716_v0, %v566_v14 }
 0x1e6   : > { %v3890_v22 = vadd.f32 %v1485_v1, %v565_v16 }
 0x1e8   : > { %v3719_v4 = vpop.f32.mrb[2].mxu1 }
 0x1e9   : > { %v1495_v5 = vpop.f32.mrb[3].mxu1  ;;  %v3892_v29 = vadd.f32 %v3719_v4, %v568_v19  ;;  %v575_v19 = vadd.f32 %v4710_v10, %v528_v43 }
 0x1ea   : > { %v3894_v33 = vadd.f32 %v1495_v5, %v567_v21  ;;  %v553_v21 = vpop.permute.xlu1 %552 }
 0x1ec   : > { %v3722_v7 = vpop.f32.mrb[4].mxu1 }
 0x1ed   : > { %v1505_v9 = vpop.f32.mrb[5].mxu1  ;;  %v3896_v44 = vadd.f32 %v3722_v7, %v570_v28  ;;  %v578_v28 = vadd.f32 %v4710_v10, %v543_v59 }
 0x1ee   : > { %v3898_v47 = vadd.f32 %v1505_v9, %v569_v32 }
 0x1f0   : > { %v3725_v11 = vpop.f32.mrb[6].mxu1 }
 0x1f1   : > { %v1515_v12 = vpop.f32.mrb[7].mxu1  ;;  %v3900_v56 = vadd.f32 %v3725_v11, %v572_v42  ;;  %v580_v42 = vadd.f32 %v4710_v10, %v553_v21 }
 0x1f2   : > { %v3902_v60 = vadd.f32 %v1515_v12, %v571_v46  ;;  %v576_v12 = vadd.f32 %v4710_v10, %v533_v39 }
 0x1f4   : > { %v4714_v17 = vpop.f32.mrb[8].mxu1 }
 0x1f5   : > { %v4716_v18 = vpop.f32.mrb[9].mxu1  ;;  %v3904_v5 = vadd.f32 %v4714_v17, %v574_v55 }
 0x1f6   : > { %v3906_v7 = vadd.f32 %v4716_v18, %v573_v58 }
 0x1f9   : > { %v3861_v24 = vpop.f32.mrb[0].mxu0 }
 0x1fa   : > { %v3889_v26 = vadd.f32 %v3888_v20, %v3861_v24  ;;  %v2745_v27 = vpop.f32.mrb[1].mxu0 }
 0x1fb   : > { %v3891_v31 = vadd.f32 %v3890_v22, %v2745_v27  ;;  %v548_v22 = vpop.permute.xlu0 %547 }
 0x1fc   : > { %vm2853_vm3 = vcmp.ge.f32.partialorder %v3889_v26, 0.0  ;;  %v2871_v30 = vmul.f32 0.2, %v3889_v26 }
 0x1fd   : > { %vm2852_vm5 = vcmp.ge.f32.partialorder %v3891_v31, 0.0  ;;  %v2870_v34 = vmul.f32 0.2, %v3891_v31  ;;  %v3864_v35 = vpop.f32.mrb[2].mxu0 }
 0x1fe   : > { %v2889_v36 = vsel %vm2853_vm3, %v3889_v26, %v2871_v30  ;;  %v3893_v37 = vadd.f32 %v3892_v29, %v3864_v35  ;;  %v2755_v38 = vpop.f32.mrb[3].mxu0 }
 0x1ff   : > { %2908 = vst.msk [vmem:[%s4228_s9 + $0x8] sm:$0xff] %vm2906_vm4, %v2889_v36  ;;  %v2888_v40 = vsel %vm2852_vm5, %v3891_v31, %v2870_v34  ;;  %v3895_v41 = vadd.f32 %v3894_v33, %v2755_v38  ;;  %v577_v33 = vadd.f32 %v4710_v10, %v538_v63 }
 0x200   : > { %2907 = vst.msk [vmem:[%s4228_s9] sm:$0xff] %vm2906_vm4, %v2888_v40  ;;  %vm2855_vm6 = vcmp.ge.f32.partialorder %v3893_v37, 0.0  ;;  %v2873_v45 = vmul.f32 0.2, %v3893_v37 }
 0x201   : > { %vm2854_vm7 = vcmp.ge.f32.partialorder %v3895_v41, 0.0  ;;  %v2872_v48 = vmul.f32 0.2, %v3895_v41  ;;  %v3867_v49 = vpop.f32.mrb[4].mxu0 }
 0x202   : > { %v2891_v50 = vsel %vm2855_vm6, %v3893_v37, %v2873_v45  ;;  %v3897_v51 = vadd.f32 %v3896_v44, %v3867_v49  ;;  %v2765_v52 = vpop.f32.mrb[5].mxu0 }
 0x203   : > { %2910 = vst.msk [vmem:[%s4228_s9 + $0x18] sm:$0xff] %vm2906_vm4, %v2891_v50  ;;  %v2890_v53 = vsel %vm2854_vm7, %v3895_v41, %v2872_v48  ;;  %v3899_v54 = vadd.f32 %v3898_v47, %v2765_v52  ;;  %v579_v47 = vadd.f32 %v4710_v10, %v548_v22  ;;  %v563_v48 = vpop.permute.xlu1 %562 }
 0x204   : > { %2909 = vst.msk [vmem:[%s4228_s9 + $0x10] sm:$0xff] %vm2906_vm4, %v2890_v53  ;;  %vm2857_vm8 = vcmp.ge.f32.partialorder %v3897_v51, 0.0  ;;  %v2875_v57 = vmul.f32 0.2, %v3897_v51  ;;  %v582_v58 = vadd.f32 %v4710_v10, %v563_v48 }
 0x205   : > { %vm2856_vm9 = vcmp.ge.f32.partialorder %v3899_v54, 0.0  ;;  %v2874_v61 = vmul.f32 0.2, %v3899_v54  ;;  %v3870_v62 = vpop.f32.mrb[6].mxu0 }
 0x206   : > { %v2893_v0 = vsel %vm2857_vm8, %v3897_v51, %v2875_v57  ;;  %v3901_v1 = vadd.f32 %v3900_v56, %v3870_v62  ;;  %v2775_v2 = vpop.f32.mrb[7].mxu0  ;;  %v558_v51 = vpop.permute.xlu0 %557 }
 0x207   : > { %2912 = vst.msk [vmem:[%s4228_s9 + $0x28] sm:$0xff] %vm2906_vm4, %v2893_v0  ;;  %v2892_v3 = vsel %vm2856_vm9, %v3899_v54, %v2874_v61  ;;  %v3903_v4 = vadd.f32 %v3902_v60, %v2775_v2  ;;  %v581_v63 = vadd.f32 %v4710_v10, %v558_v51 }
 0x208   : > { %2911 = vst.msk [vmem:[%s4228_s9 + $0x20] sm:$0xff] %vm2906_vm4, %v2892_v3  ;;  %vm2859_vm10 = vcmp.ge.f32.partialorder %v3901_v1, 0.0  ;;  %v2877_v6 = vmul.f32 0.2, %v3901_v1  ;;  %v3760_v9 = vpop.f32.mrb[10].mxu1 }
 0x209   : > { %vm2858_vm11 = vcmp.ge.f32.partialorder %v3903_v4, 0.0  ;;  %v2876_v8 = vmul.f32 0.2, %v3903_v4  ;;  %v3873_v11 = vpop.f32.mrb[8].mxu0  ;;  %v1787_v15 = vpop.f32.mrb[11].mxu1  ;;  %v3908_v18 = vadd.f32 %v3760_v9, %v576_v12 }
 0x20a   : > { %v2895_v13 = vsel %vm2859_vm10, %v3901_v1, %v2877_v6  ;;  %v3905_v14 = vadd.f32 %v3904_v5, %v3873_v11  ;;  %v2785_v16 = vpop.f32.mrb[9].mxu0  ;;  %v3910_v24 = vadd.f32 %v1787_v15, %v575_v19 }
 0x20b   : > { %2914 = vst.msk [vmem:[%s4228_s9 + $0x38] sm:$0xff] %vm2906_vm4, %v2895_v13  ;;  %v2894_v17 = vsel %vm2858_vm11, %v3903_v4, %v2876_v8  ;;  %v3907_v20 = vadd.f32 %v3906_v7, %v2785_v16 }
 0x20c   : > { %2913 = vst.msk [vmem:[%s4228_s9 + $0x30] sm:$0xff] %vm2906_vm4, %v2894_v17  ;;  %vm2861_vm12 = vcmp.ge.f32.partialorder %v3905_v14, 0.0  ;;  %v2879_v23 = vmul.f32 0.2, %v3905_v14  ;;  %v3763_v26 = vpop.f32.mrb[12].mxu1 }
 0x20d   : > { %vm2860_vm13 = vcmp.ge.f32.partialorder %v3907_v20, 0.0  ;;  %v2878_v25 = vmul.f32 0.2, %v3907_v20  ;;  %v3876_v27 = vpop.f32.mrb[10].mxu0  ;;  %v1797_v30 = vpop.f32.mrb[13].mxu1  ;;  %v3912_v36 = vadd.f32 %v3763_v26, %v578_v28 }
 0x20e   : > { %v2897_v31 = vsel %vm2861_vm12, %v3905_v14, %v2879_v23  ;;  %v3909_v29 = vadd.f32 %v3908_v18, %v3876_v27  ;;  %v2795_v32 = vpop.f32.mrb[11].mxu0  ;;  %v3914_v38 = vadd.f32 %v1797_v30, %v577_v33 }
 0x20f   : > { %2916 = vst.msk [vmem:[%s4228_s9 + $0x48] sm:$0xff] %vm2906_vm4, %v2897_v31  ;;  %v2896_v34 = vsel %vm2860_vm13, %v3907_v20, %v2878_v25  ;;  %v3911_v35 = vadd.f32 %v3910_v24, %v2795_v32 }
 0x210   : > { %2915 = vst.msk [vmem:[%s4228_s9 + $0x40] sm:$0xff] %vm2906_vm4, %v2896_v34  ;;  %vm2863_vm14 = vcmp.ge.f32.partialorder %v3909_v29, 0.0  ;;  %v2881_v37 = vmul.f32 0.2, %v3909_v29  ;;  %v3766_v40 = vpop.f32.mrb[14].mxu1 }
 0x211   : > { %vm2862_vm15 = vcmp.ge.f32.partialorder %v3911_v35, 0.0  ;;  %v2880_v39 = vmul.f32 0.2, %v3911_v35  ;;  %v3879_v41 = vpop.f32.mrb[12].mxu0  ;;  %v1807_v45 = vpop.f32.mrb[15].mxu1  ;;  %v3916_v52 = vadd.f32 %v3766_v40, %v580_v42 }
 0x212   : > { %v2899_v43 = vsel %vm2863_vm14, %v3909_v29, %v2881_v37  ;;  %v3913_v44 = vadd.f32 %v3912_v36, %v3879_v41  ;;  %v2805_v46 = vpop.f32.mrb[13].mxu0  ;;  %v3918_v54 = vadd.f32 %v1807_v45, %v579_v47 }
 0x213   : > { %2918 = vst.msk [vmem:[%s4228_s9 + $0x58] sm:$0xff] %vm2906_vm4, %v2899_v43  ;;  %v2898_v49 = vsel %vm2862_vm15, %v3911_v35, %v2880_v39  ;;  %v3915_v50 = vadd.f32 %v3914_v38, %v2805_v46 }
 0x214   : > { %2917 = vst.msk [vmem:[%s4228_s9 + $0x50] sm:$0xff] %vm2906_vm4, %v2898_v49  ;;  %vm2865_vm0 = vcmp.ge.f32.partialorder %v3913_v44, 0.0  ;;  %v2883_v53 = vmul.f32 0.2, %v3913_v44  ;;  %v3769_v56 = vpop.f32.mrb[16].mxu1 }
 0x215   : > { %vm2864_vm1 = vcmp.ge.f32.partialorder %v3915_v50, 0.0  ;;  %v2882_v55 = vmul.f32 0.2, %v3915_v50  ;;  %v3882_v57 = vpop.f32.mrb[14].mxu0  ;;  %v1817_v61 = vpop.f32.mrb[17].mxu1  ;;  %v3920_v2 = vadd.f32 %v3769_v56, %v582_v58 }
 0x216   : > { %v2901_v59 = vsel %vm2865_vm0, %v3913_v44, %v2883_v53  ;;  %v3917_v60 = vadd.f32 %v3916_v52, %v3882_v57  ;;  %v2815_v62 = vpop.f32.mrb[15].mxu0  ;;  %v3922_v4 = vadd.f32 %v1817_v61, %v581_v63 }
 0x217   : > { %2920 = vst.msk [vmem:[%s4228_s9 + $0x68] sm:$0xff] %vm2906_vm4, %v2901_v59  ;;  %v2900_v0 = vsel %vm2864_vm1, %v3915_v50, %v2882_v55  ;;  %v3919_v1 = vadd.f32 %v3918_v54, %v2815_v62 }
 0x218   : > { %2919 = vst.msk [vmem:[%s4228_s9 + $0x60] sm:$0xff] %vm2906_vm4, %v2900_v0  ;;  %vm2867_vm2 = vcmp.ge.f32.partialorder %v3917_v60, 0.0  ;;  %v2885_v3 = vmul.f32 0.2, %v3917_v60 }
 0x219   : > { %vm2866_vm3 = vcmp.ge.f32.partialorder %v3919_v1, 0.0  ;;  %v2884_v5 = vmul.f32 0.2, %v3919_v1  ;;  %v3885_v6 = vpop.f32.mrb[16].mxu0 }
 0x21a   : > { %v2903_v7 = vsel %vm2867_vm2, %v3917_v60, %v2885_v3  ;;  %v3921_v8 = vadd.f32 %v3920_v2, %v3885_v6  ;;  %v2825_v9 = vpop.f32.mrb[17].mxu0 }
 0x21b   : > { %2922 = vst.msk [vmem:[%s4228_s9 + $0x78] sm:$0xff] %vm2906_vm4, %v2903_v7  ;;  %v2902_v10 = vsel %vm2866_vm3, %v3919_v1, %v2884_v5  ;;  %v3923_v11 = vadd.f32 %v3922_v4, %v2825_v9 }
 0x21c   : > { %2921 = vst.msk [vmem:[%s4228_s9 + $0x70] sm:$0xff] %vm2906_vm4, %v2902_v10  ;;  %vm2869_vm5 = vcmp.ge.f32.partialorder %v3921_v8, 0.0  ;;  %v2887_v12 = vmul.f32 0.2, %v3921_v8 }
 0x21d   : > { %vm2868_vm6 = vcmp.ge.f32.partialorder %v3923_v11, 0.0  ;;  %v2886_v13 = vmul.f32 0.2, %v3923_v11 }
 0x21e   : > { %v2905_v14 = vsel %vm2869_vm5, %v3921_v8, %v2887_v12 }
 0x21f   : > { %2924 = vst.msk [vmem:[%s4228_s9 + $0x88] sm:$0xff] %vm2906_vm4, %v2905_v14  ;;  %v2904_v15 = vsel %vm2868_vm6, %v3923_v11, %v2886_v13 }
 0x220   : > { %2923 = vst.msk [vmem:[%s4228_s9 + $0x80] sm:$0xff] %vm2906_vm4, %v2904_v15 }
 0x221 PF: > { %s16_s25 = sadd.s32 1, %s4136_s25   ;;  %s4796_s16 = sld [smem:[#allocation3_spill]] }
 0x222   : > { %p13_p8 = scmp.ge.s32.totalorder %s16_s25, 6   ;;  %s4797_s27 = sld [smem:[#allocation4_spill]] }
 0x223   : > { %s4798_s21 = smov %s4128_s23  ;;  %s4799_s22 = smov %s4132_s24 }
 0x224   :  { %15 = sbr.rel (!%p13_p8) target bundleno = 3 (0x3), region = 110 }
 0x227   : > { %s4800_s23 = smov %s4796_s16 }
 0x228   : > { %s4801_s24 = smov %s4797_s27 }

</bundles_post_ra>
